<compile_context>
chip_gen: v7x
topology: tpu7x:2x2x1
jax: 0.10.0
libtpu: 0.0.40
codegen_flags: <defaults>
</compile_context>

<pallas_src>
import functools

import jax
import jax.numpy as jnp
from jax.experimental import pallas as pl
from jax.experimental.pallas import tpu as pltpu

_VMEM = pltpu.MemorySpace.VMEM
_SMEM = pltpu.MemorySpace.SMEM


# ----------------------------------------------------------------------------
# Kernel
# ----------------------------------------------------------------------------
def _per_side_ref_count(num_paths, num_layers):
    # graphs, emb0, wcat0, per-path layer>=1 weights, W1 row-segments, b1, w2
    return 3 + num_paths * (num_layers - 1) + (num_layers + 1) + 2


def _process_side(alpha, refs, out_ref, num_paths, layer_dims):
    num_layers = len(layer_dims) - 1
    graphs_ref = refs[0]                       # bf16 [P, N, N]
    emb0_ref = refs[1]                         # f32  [N, D0]
    wcat0_ref = refs[2]                        # bf16 [D0, P*D1]
    base = 3
    w_rest_refs = refs[base:base + num_paths * (num_layers - 1)]
    base += num_paths * (num_layers - 1)
    w1seg_refs = refs[base:base + num_layers + 1]
    base += num_layers + 1
    b1_ref, w2_ref = refs[base], refs[base + 1]

    emb0 = emb0_ref[...]                       # f32, also used directly in output
    n = emb0.shape[0]
    d0, d1 = layer_dims[0], layer_dims[1]
    emb0_bf = emb0.astype(jnp.bfloat16)

    graphs = [graphs_ref[p] for p in range(num_paths)]   # bf16 [N, N] each

    # ---- layer 0: emb0 is shared by every path -> lane-packed weights give
    #      ONE MXU matmul for all paths (exact, no redundant FLOPs) -----------
    xw_all = jnp.dot(emb0_bf, wcat0_ref[...],
                     preferred_element_type=jnp.float32)          # [N, P*D1]

    embs = []                                  # un-normalized PReLU output fed forward
    segs = [[] for _ in range(num_paths)]      # L2-normalized per-layer segments
    for p in range(num_paths):
        xw_p = xw_all[:, p * d1:(p + 1) * d1].astype(jnp.bfloat16)
        h = jnp.dot(graphs[p], xw_p, preferred_element_type=jnp.float32)
        y = jnp.where(h >= 0.0, h, alpha * h)                     # PReLU (f32, VPU)
        inv = jax.lax.rsqrt(jnp.maximum(
            jnp.sum(y * y, axis=1, keepdims=True), 1e-24))        # F.normalize eps
        segs[p].append(y * inv)
        embs.append(y)                         # reference feeds the raw output forward

    # ---- layers 1..L-1: per-path (embeddings now differ per path) -----------
    for l in range(1, num_layers):
        for p in range(num_paths):
            w = w_rest_refs[p * (num_layers - 1) + (l - 1)][...]  # bf16
            xw = jnp.dot(embs[p].astype(jnp.bfloat16), w,
                         preferred_element_type=jnp.float32)
            h = jnp.dot(graphs[p], xw.astype(jnp.bfloat16),
                        preferred_element_type=jnp.float32)
            y = jnp.where(h >= 0.0, h, alpha * h)
            inv = jax.lax.rsqrt(jnp.maximum(
                jnp.sum(y * y, axis=1, keepdims=True), 1e-24))
            segs[p].append(y * inv)
            embs[p] = y

    # ---- semantic attention: per-segment matmuls, no lane concatenation -----
    b1 = b1_ref[...]                           # f32 [1, H]
    w2 = w2_ref[...]                           # f32 [1, H]  (Linear(H,1) weight row)
    base_proj = jnp.dot(emb0_bf, w1seg_refs[0][...],
                        preferred_element_type=jnp.float32) + b1  # [N, H], shared

    inv_n = 1.0 / float(n)
    scores = []
    for p in range(num_paths):
        proj = base_proj
        for j in range(num_layers):
            proj = proj + jnp.dot(segs[p][j].astype(jnp.bfloat16),
                                  w1seg_refs[j + 1][...],
                                  preferred_element_type=jnp.float32)
        hp = jnp.tanh(proj)                                       # EUP
        # mean over nodes of <tanh(.), w2>: one VPU mul + one full reduce
        scores.append(jnp.sum(hp * w2, keepdims=True) * inv_n)    # (1, 1)

    # softmax over the P path scores; one approx reciprocal instead of P divides
    m = scores[0]
    for p in range(1, num_paths):
        m = jnp.maximum(m, scores[p])
    exps = [jnp.exp(s - m) for s in scores]
    denom = exps[0]
    for p in range(1, num_paths):
        denom = denom + exps[p]
    inv_denom = pl.reciprocal(denom, approx=True)
    betas = [e * inv_denom for e in exps]                         # (1, 1) each

    # ---- weighted combination, written as static lane slices of out_ref -----
    beta_sum = betas[0]
    for p in range(1, num_paths):
        beta_sum = beta_sum + betas[p]
    out_ref[:, 0:d0] = emb0 * beta_sum         # segment 0 is emb0 for every path
    off = d0
    for j in range(num_layers):
        dj = layer_dims[j + 1]
        acc = betas[0] * segs[0][j]
        for p in range(1, num_paths):
            acc = acc + betas[p] * segs[p][j]
        out_ref[:, off:off + dj] = acc
        off += dj


def fused_model_kernel(alpha_ref, *refs, num_paths_u, num_paths_i, layer_dims):
    num_layers = len(layer_dims) - 1
    n_u = _per_side_ref_count(num_paths_u, num_layers)
    n_i = _per_side_ref_count(num_paths_i, num_layers)
    u_refs = refs[:n_u]
    i_refs = refs[n_u:n_u + n_i]
    out_u = refs[n_u + n_i]
    out_i = refs[n_u + n_i + 1]

    alpha = alpha_ref[0, 0]                    # shared nn.PReLU() slope from SMEM
    # TODO(synk): on v7x, map the two independent sides onto the two TensorCores
    # via pl.core_map instead of processing them sequentially here.
    _process_side(alpha, u_refs, out_u, num_paths_u, layer_dims)
    _process_side(alpha, i_refs, out_i, num_paths_i, layer_dims)


# ----------------------------------------------------------------------------
# Wrapper: single pallas_call for both sides
# ----------------------------------------------------------------------------
def _pack_side_inputs(graphs, emb0, gcn_ws, att_w1, att_b1, att_w2):
    num_paths = len(gcn_ws)
    num_layers = len(gcn_ws[0])
    layer_dims = [int(emb0.shape[1])] + [int(w.shape[1]) for w in gcn_ws[0]]

    graphs_bf = jnp.stack(graphs, axis=0).astype(jnp.bfloat16)          # [P, N, N]
    # lane-pack the layer-0 weights (shared emb0 -> one matmul for all paths)
    wcat0 = jnp.concatenate([gcn_ws[p][0] for p in range(num_paths)],
                            axis=1).astype(jnp.bfloat16)                # [D0, P*D1]
    w_rest = [gcn_ws[p][l].astype(jnp.bfloat16)
              for p in range(num_paths) for l in range(1, num_layers)]
    # split W1 by rows into per-segment blocks (avoids in-kernel lane concat)
    w1_segs, off = [], 0
    for d in layer_dims:
        w1_segs.append(att_w1[off:off + d, :].astype(jnp.bfloat16))
        off += d

    inputs = [graphs_bf, emb0, wcat0] + w_rest + w1_segs + [att_b1, att_w2]
    return inputs, num_paths, layer_dims


def model_forward(user_graphs, item_graphs, params):
    alpha = params["prelu_alpha"]              # single nn.PReLU() shared by all GraphConvs

    u_inputs, p_u, layer_dims = _pack_side_inputs(
        user_graphs, params["user_emb"], params["user_gcn_w"],
        params["att_u_w1"], params["att_u_b1"], params["att_u_w2"])
    i_inputs, p_i, layer_dims_i = _pack_side_inputs(
        item_graphs, params["item_emb"], params["item_gcn_w"],
        params["att_i_w1"], params["att_i_b1"], params["att_i_w2"])
    assert layer_dims == layer_dims_i

    f = sum(layer_dims)                        # in_size (96)
    nu = int(params["user_emb"].shape[0])
    ni = int(params["item_emb"].shape[0])
    h = int(params["att_u_w1"].shape[1])
    num_layers = len(layer_dims) - 1

    kernel = functools.partial(
        fused_model_kernel,
        num_paths_u=p_u, num_paths_i=p_i, layer_dims=layer_dims)

    all_inputs = [alpha] + u_inputs + i_inputs
    n_vmem = len(u_inputs) + len(i_inputs)

    # advisory cost estimate so XLA can overlap surrounding ops / DMAs
    def _side_flops(p, n):
        fl = 0
        for l in range(num_layers):
            fl += 2 * p * (n * layer_dims[l] * layer_dims[l + 1]
                           + n * n * layer_dims[l + 1])
        fl += 2 * p * n * f * h + 2 * p * n * h
        return fl

    flops = _side_flops(p_u, nu) + _side_flops(p_i, ni)
    transcendentals = (p_u * nu + p_i * ni) * h + 4 * (p_u + p_i)
    bytes_accessed = sum(int(x.size) * x.dtype.itemsize for x in all_inputs)
    bytes_accessed += (nu + ni) * f * 4

    user_out, item_out = pl.pallas_call(
        kernel,
        out_shape=(jax.ShapeDtypeStruct((nu, f), jnp.float32),
                   jax.ShapeDtypeStruct((ni, f), jnp.float32)),
        in_specs=[pl.BlockSpec(memory_space=_SMEM)]           # alpha scalar
                 + [pl.BlockSpec(memory_space=_VMEM)] * n_vmem,
        out_specs=(pl.BlockSpec(memory_space=_VMEM),
                   pl.BlockSpec(memory_space=_VMEM)),
        cost_estimate=pl.CostEstimate(
            flops=flops, transcendentals=transcendentals,
            bytes_accessed=bytes_accessed),
    )(*all_inputs)
    return user_out, item_out


# ----------------------------------------------------------------------------
# Deterministic parameter / input construction
# ----------------------------------------------------------------------------
def xavier_uniform(key, shape):
    fan_in, fan_out = shape[0], shape[1]
    bound = jnp.sqrt(6.0 / (fan_in + fan_out))
    return jax.random.uniform(key, shape, jnp.float32, -bound, bound)


def make_norm_adj(key, n):
    a = (jax.random.uniform(key, (n, n)) < 0.3).astype(jnp.float32)
    a = jnp.maximum(a, a.T)
    a = a + jnp.eye(n, dtype=jnp.float32)      # self loops (guards deg==0 too)
    deg = jnp.sum(a, axis=1)
    d_inv_sqrt = 1.0 / jnp.sqrt(deg)
    return a * d_inv_sqrt[:, None] * d_inv_sqrt[None, :]


if __name__ == "__main__":
    key = jax.random.PRNGKey(0)

    userMetaPathNum, itemMetaPathNum = 2, 2
    userNum, itemNum = 16, 24
    hide_dim = 32
    layer = [32, 32]                       # GCN output dims per block
    layer_sizes = [hide_dim] + layer       # self.layer
    in_size = int(sum(layer_sizes))        # 96
    attn_hidden = 128

    keys = iter(jax.random.split(key, 64))

    params = {
        "user_emb": xavier_uniform(next(keys), (userNum, hide_dim)),
        "item_emb": xavier_uniform(next(keys), (itemNum, hide_dim)),
        "prelu_alpha": jnp.full((1, 1), 0.25, jnp.float32),  # nn.PReLU() default
        "user_gcn_w": [
            [
                xavier_uniform(next(keys), (layer_sizes[j], layer_sizes[j + 1]))
                for j in range(len(layer_sizes) - 1)
            ]
            for _ in range(userMetaPathNum)
        ],
        "item_gcn_w": [
            [
                xavier_uniform(next(keys), (layer_sizes[j], layer_sizes[j + 1]))
                for j in range(len(layer_sizes) - 1)
            ]
            for _ in range(itemMetaPathNum)
        ],
        "att_u_w1": xavier_uniform(next(keys), (in_size, attn_hidden)),
        "att_u_b1": jnp.zeros((1, attn_hidden), jnp.float32),
        "att_u_w2": xavier_uniform(next(keys), (1, attn_hidden)),   # Linear(H,1,bias=False) row
        "att_i_w1": xavier_uniform(next(keys), (in_size, attn_hidden)),
        "att_i_b1": jnp.zeros((1, attn_hidden), jnp.float32),
        "att_i_w2": xavier_uniform(next(keys), (1, attn_hidden)),   # Linear(H,1,bias=False) row
    }

    user_graphs = [make_norm_adj(next(keys), userNum) for _ in range(userMetaPathNum)]
    item_graphs = [make_norm_adj(next(keys), itemNum) for _ in range(itemMetaPathNum)]

    user_embed, item_embed = model_forward(user_graphs, item_graphs, params)
    jax.block_until_ready((user_embed, item_embed))

    assert user_embed.shape == (userNum, in_size)
    assert item_embed.shape == (itemNum, in_size)
    print("KERNEL_OK")
</pallas_src>

<mosaic_0001>
module attributes {stable_mosaic.version = 11 : i64} {
  func.func @fused_model_kernel(%arg0: memref<1x1xf32, #tpu.memory_space<smem>>, %arg1: memref<2x16x16xbf16, #tpu.memory_space<vmem>>, %arg2: memref<16x32xf32, #tpu.memory_space<vmem>>, %arg3: memref<32x64xbf16, #tpu.memory_space<vmem>>, %arg4: memref<32x32xbf16, #tpu.memory_space<vmem>>, %arg5: memref<32x32xbf16, #tpu.memory_space<vmem>>, %arg6: memref<32x128xbf16, #tpu.memory_space<vmem>>, %arg7: memref<32x128xbf16, #tpu.memory_space<vmem>>, %arg8: memref<32x128xbf16, #tpu.memory_space<vmem>>, %arg9: memref<1x128xf32, #tpu.memory_space<vmem>>, %arg10: memref<1x128xf32, #tpu.memory_space<vmem>>, %arg11: memref<2x24x24xbf16, #tpu.memory_space<vmem>>, %arg12: memref<24x32xf32, #tpu.memory_space<vmem>>, %arg13: memref<32x64xbf16, #tpu.memory_space<vmem>>, %arg14: memref<32x32xbf16, #tpu.memory_space<vmem>>, %arg15: memref<32x32xbf16, #tpu.memory_space<vmem>>, %arg16: memref<32x128xbf16, #tpu.memory_space<vmem>>, %arg17: memref<32x128xbf16, #tpu.memory_space<vmem>>, %arg18: memref<32x128xbf16, #tpu.memory_space<vmem>>, %arg19: memref<1x128xf32, #tpu.memory_space<vmem>>, %arg20: memref<1x128xf32, #tpu.memory_space<vmem>>, %arg21: memref<16x96xf32, #tpu.memory_space<vmem>>, %arg22: memref<24x96xf32, #tpu.memory_space<vmem>>) attributes {dimension_semantics = [], scalar_prefetch = 0 : i64, scratch_operands = 0 : i64, tpu.core_type = #tpu.core_type<tc>} {
    %c0 = arith.constant 0 : index
    %c0_0 = arith.constant 0 : index
    %0 = memref.load %arg0[%c0, %c0_0] : memref<1x1xf32, #tpu.memory_space<smem>>
    %c0_1 = arith.constant 0 : index
    %c0_2 = arith.constant 0 : index
    %1 = vector.load %arg2[%c0_1, %c0_2] : memref<16x32xf32, #tpu.memory_space<vmem>>, vector<16x32xf32>
    %2 = arith.truncf %1 : vector<16x32xf32> to vector<16x32xbf16>
    %c0_3 = arith.constant 0 : index
    %c0_4 = arith.constant 0 : index
    %c0_5 = arith.constant 0 : index
    %3 = vector.load %arg1[%c0_3, %c0_4, %c0_5] : memref<2x16x16xbf16, #tpu.memory_space<vmem>>, vector<1x16x16xbf16>
    %4 = vector.shape_cast %3 : vector<1x16x16xbf16> to vector<16x16xbf16>
    %c1 = arith.constant 1 : index
    %c0_6 = arith.constant 0 : index
    %c0_7 = arith.constant 0 : index
    %5 = vector.load %arg1[%c1, %c0_6, %c0_7] : memref<2x16x16xbf16, #tpu.memory_space<vmem>>, vector<1x16x16xbf16>
    %6 = vector.shape_cast %5 : vector<1x16x16xbf16> to vector<16x16xbf16>
    %c0_8 = arith.constant 0 : index
    %c0_9 = arith.constant 0 : index
    %7 = vector.load %arg3[%c0_8, %c0_9] : memref<32x64xbf16, #tpu.memory_space<vmem>>, vector<32x64xbf16>
    %cst = arith.constant dense<0.000000e+00> : vector<16x64xf32>
    %8 = tpu.matmul %2, %7, %cst {dimension_numbers = #tpu.dot_dimension_numbers<[1], [0], [0], [1], [0, 0, 1, 1], [], []>} : vector<16x32xbf16>, vector<32x64xbf16>, vector<16x64xf32> -> vector<16x64xf32>
    %9 = vector.extract_strided_slice %8 {offsets = [0, 0], sizes = [16, 32], strides = [1, 1]} : vector<16x64xf32> to vector<16x32xf32>
    %10 = arith.truncf %9 : vector<16x32xf32> to vector<16x32xbf16>
    %cst_10 = arith.constant dense<0.000000e+00> : vector<16x32xf32>
    %11 = tpu.matmul %4, %10, %cst_10 {dimension_numbers = #tpu.dot_dimension_numbers<[1], [0], [0], [1], [0, 0, 1, 1], [], []>} : vector<16x16xbf16>, vector<16x32xbf16>, vector<16x32xf32> -> vector<16x32xf32>
    %cst_11 = arith.constant 0.000000e+00 : f32
    %12 = vector.broadcast %cst_11 : f32 to vector<16x32xf32>
    %13 = arith.cmpf oge, %11, %12 : vector<16x32xf32>
    %14 = vector.broadcast %0 : f32 to vector<16x32xf32>
    %15 = arith.mulf %14, %11 : vector<16x32xf32>
    %16 = arith.select %13, %11, %15 : vector<16x32xi1>, vector<16x32xf32>
    %17 = arith.mulf %16, %16 : vector<16x32xf32>
    %cst_12 = arith.constant dense<0.000000e+00> : vector<16xf32>
    %18 = vector.multi_reduction <add>, %17, %cst_12 [1] : vector<16x32xf32> to vector<16xf32>
    %19 = vector.shape_cast %18 : vector<16xf32> to vector<16x1xf32>
    %cst_13 = arith.constant 1.000000e-24 : f32
    %20 = vector.broadcast %cst_13 : f32 to vector<16x1xf32>
    %21 = arith.maximumf %19, %20 : vector<16x1xf32>
    %22 = math.rsqrt %21 : vector<16x1xf32>
    %23 = vector.broadcast %22 : vector<16x1xf32> to vector<16x32xf32>
    %24 = arith.mulf %16, %23 : vector<16x32xf32>
    %25 = vector.extract_strided_slice %8 {offsets = [0, 32], sizes = [16, 32], strides = [1, 1]} : vector<16x64xf32> to vector<16x32xf32>
    %26 = arith.truncf %25 : vector<16x32xf32> to vector<16x32xbf16>
    %cst_14 = arith.constant dense<0.000000e+00> : vector<16x32xf32>
    %27 = tpu.matmul %6, %26, %cst_14 {dimension_numbers = #tpu.dot_dimension_numbers<[1], [0], [0], [1], [0, 0, 1, 1], [], []>} : vector<16x16xbf16>, vector<16x32xbf16>, vector<16x32xf32> -> vector<16x32xf32>
    %cst_15 = arith.constant 0.000000e+00 : f32
    %28 = vector.broadcast %cst_15 : f32 to vector<16x32xf32>
    %29 = arith.cmpf oge, %27, %28 : vector<16x32xf32>
    %30 = vector.broadcast %0 : f32 to vector<16x32xf32>
    %31 = arith.mulf %30, %27 : vector<16x32xf32>
    %32 = arith.select %29, %27, %31 : vector<16x32xi1>, vector<16x32xf32>
    %33 = arith.mulf %32, %32 : vector<16x32xf32>
    %cst_16 = arith.constant dense<0.000000e+00> : vector<16xf32>
    %34 = vector.multi_reduction <add>, %33, %cst_16 [1] : vector<16x32xf32> to vector<16xf32>
    %35 = vector.shape_cast %34 : vector<16xf32> to vector<16x1xf32>
    %cst_17 = arith.constant 1.000000e-24 : f32
    %36 = vector.broadcast %cst_17 : f32 to vector<16x1xf32>
    %37 = arith.maximumf %35, %36 : vector<16x1xf32>
    %38 = math.rsqrt %37 : vector<16x1xf32>
    %39 = vector.broadcast %38 : vector<16x1xf32> to vector<16x32xf32>
    %40 = arith.mulf %32, %39 : vector<16x32xf32>
    %c0_18 = arith.constant 0 : index
    %c0_19 = arith.constant 0 : index
    %41 = vector.load %arg4[%c0_18, %c0_19] : memref<32x32xbf16, #tpu.memory_space<vmem>>, vector<32x32xbf16>
    %42 = arith.truncf %16 : vector<16x32xf32> to vector<16x32xbf16>
    %cst_20 = arith.constant dense<0.000000e+00> : vector<16x32xf32>
    %43 = tpu.matmul %42, %41, %cst_20 {dimension_numbers = #tpu.dot_dimension_numbers<[1], [0], [0], [1], [0, 0, 1, 1], [], []>} : vector<16x32xbf16>, vector<32x32xbf16>, vector<16x32xf32> -> vector<16x32xf32>
    %44 = arith.truncf %43 : vector<16x32xf32> to vector<16x32xbf16>
    %cst_21 = arith.constant dense<0.000000e+00> : vector<16x32xf32>
    %45 = tpu.matmul %4, %44, %cst_21 {dimension_numbers = #tpu.dot_dimension_numbers<[1], [0], [0], [1], [0, 0, 1, 1], [], []>} : vector<16x16xbf16>, vector<16x32xbf16>, vector<16x32xf32> -> vector<16x32xf32>
    %cst_22 = arith.constant 0.000000e+00 : f32
    %46 = vector.broadcast %cst_22 : f32 to vector<16x32xf32>
    %47 = arith.cmpf oge, %45, %46 : vector<16x32xf32>
    %48 = vector.broadcast %0 : f32 to vector<16x32xf32>
    %49 = arith.mulf %48, %45 : vector<16x32xf32>
    %50 = arith.select %47, %45, %49 : vector<16x32xi1>, vector<16x32xf32>
    %51 = arith.mulf %50, %50 : vector<16x32xf32>
    %cst_23 = arith.constant dense<0.000000e+00> : vector<16xf32>
    %52 = vector.multi_reduction <add>, %51, %cst_23 [1] : vector<16x32xf32> to vector<16xf32>
    %53 = vector.shape_cast %52 : vector<16xf32> to vector<16x1xf32>
    %cst_24 = arith.constant 1.000000e-24 : f32
    %54 = vector.broadcast %cst_24 : f32 to vector<16x1xf32>
    %55 = arith.maximumf %53, %54 : vector<16x1xf32>
    %56 = math.rsqrt %55 : vector<16x1xf32>
    %57 = vector.broadcast %56 : vector<16x1xf32> to vector<16x32xf32>
    %58 = arith.mulf %50, %57 : vector<16x32xf32>
    %c0_25 = arith.constant 0 : index
    %c0_26 = arith.constant 0 : index
    %59 = vector.load %arg5[%c0_25, %c0_26] : memref<32x32xbf16, #tpu.memory_space<vmem>>, vector<32x32xbf16>
    %60 = arith.truncf %32 : vector<16x32xf32> to vector<16x32xbf16>
    %cst_27 = arith.constant dense<0.000000e+00> : vector<16x32xf32>
    %61 = tpu.matmul %60, %59, %cst_27 {dimension_numbers = #tpu.dot_dimension_numbers<[1], [0], [0], [1], [0, 0, 1, 1], [], []>} : vector<16x32xbf16>, vector<32x32xbf16>, vector<16x32xf32> -> vector<16x32xf32>
    %62 = arith.truncf %61 : vector<16x32xf32> to vector<16x32xbf16>
    %cst_28 = arith.constant dense<0.000000e+00> : vector<16x32xf32>
    %63 = tpu.matmul %6, %62, %cst_28 {dimension_numbers = #tpu.dot_dimension_numbers<[1], [0], [0], [1], [0, 0, 1, 1], [], []>} : vector<16x16xbf16>, vector<16x32xbf16>, vector<16x32xf32> -> vector<16x32xf32>
    %cst_29 = arith.constant 0.000000e+00 : f32
    %64 = vector.broadcast %cst_29 : f32 to vector<16x32xf32>
    %65 = arith.cmpf oge, %63, %64 : vector<16x32xf32>
    %66 = vector.broadcast %0 : f32 to vector<16x32xf32>
    %67 = arith.mulf %66, %63 : vector<16x32xf32>
    %68 = arith.select %65, %63, %67 : vector<16x32xi1>, vector<16x32xf32>
    %69 = arith.mulf %68, %68 : vector<16x32xf32>
    %cst_30 = arith.constant dense<0.000000e+00> : vector<16xf32>
    %70 = vector.multi_reduction <add>, %69, %cst_30 [1] : vector<16x32xf32> to vector<16xf32>
    %71 = vector.shape_cast %70 : vector<16xf32> to vector<16x1xf32>
    %cst_31 = arith.constant 1.000000e-24 : f32
    %72 = vector.broadcast %cst_31 : f32 to vector<16x1xf32>
    %73 = arith.maximumf %71, %72 : vector<16x1xf32>
    %74 = math.rsqrt %73 : vector<16x1xf32>
    %75 = vector.broadcast %74 : vector<16x1xf32> to vector<16x32xf32>
    %76 = arith.mulf %68, %75 : vector<16x32xf32>
    %c0_32 = arith.constant 0 : index
    %c0_33 = arith.constant 0 : index
    %77 = vector.load %arg9[%c0_32, %c0_33] : memref<1x128xf32, #tpu.memory_space<vmem>>, vector<1x128xf32>
    %c0_34 = arith.constant 0 : index
    %c0_35 = arith.constant 0 : index
    %78 = vector.load %arg10[%c0_34, %c0_35] : memref<1x128xf32, #tpu.memory_space<vmem>>, vector<1x128xf32>
    %c0_36 = arith.constant 0 : index
    %c0_37 = arith.constant 0 : index
    %79 = vector.load %arg6[%c0_36, %c0_37] : memref<32x128xbf16, #tpu.memory_space<vmem>>, vector<32x128xbf16>
    %cst_38 = arith.constant dense<0.000000e+00> : vector<16x128xf32>
    %80 = tpu.matmul %2, %79, %cst_38 {dimension_numbers = #tpu.dot_dimension_numbers<[1], [0], [0], [1], [0, 0, 1, 1], [], []>} : vector<16x32xbf16>, vector<32x128xbf16>, vector<16x128xf32> -> vector<16x128xf32>
    %81 = vector.broadcast %77 : vector<1x128xf32> to vector<16x128xf32>
    %82 = arith.addf %80, %81 : vector<16x128xf32>
    %83 = arith.truncf %24 : vector<16x32xf32> to vector<16x32xbf16>
    %c0_39 = arith.constant 0 : index
    %c0_40 = arith.constant 0 : index
    %84 = vector.load %arg7[%c0_39, %c0_40] : memref<32x128xbf16, #tpu.memory_space<vmem>>, vector<32x128xbf16>
    %cst_41 = arith.constant dense<0.000000e+00> : vector<16x128xf32>
    %85 = tpu.matmul %83, %84, %cst_41 {dimension_numbers = #tpu.dot_dimension_numbers<[1], [0], [0], [1], [0, 0, 1, 1], [], []>} : vector<16x32xbf16>, vector<32x128xbf16>, vector<16x128xf32> -> vector<16x128xf32>
    %86 = arith.addf %82, %85 : vector<16x128xf32>
    %87 = arith.truncf %58 : vector<16x32xf32> to vector<16x32xbf16>
    %c0_42 = arith.constant 0 : index
    %c0_43 = arith.constant 0 : index
    %88 = vector.load %arg8[%c0_42, %c0_43] : memref<32x128xbf16, #tpu.memory_space<vmem>>, vector<32x128xbf16>
    %cst_44 = arith.constant dense<0.000000e+00> : vector<16x128xf32>
    %89 = tpu.matmul %87, %88, %cst_44 {dimension_numbers = #tpu.dot_dimension_numbers<[1], [0], [0], [1], [0, 0, 1, 1], [], []>} : vector<16x32xbf16>, vector<32x128xbf16>, vector<16x128xf32> -> vector<16x128xf32>
    %90 = arith.addf %86, %89 : vector<16x128xf32>
    %91 = math.tanh %90 : vector<16x128xf32>
    %92 = vector.broadcast %78 : vector<1x128xf32> to vector<16x128xf32>
    %93 = arith.mulf %91, %92 : vector<16x128xf32>
    %94 = vector.shape_cast %93 : vector<16x128xf32> to vector<1x16x128xf32>
    %cst_45 = arith.constant dense<0.000000e+00> : vector<1xf32>
    %95 = vector.multi_reduction <add>, %94, %cst_45 [1, 2] : vector<1x16x128xf32> to vector<1xf32>
    %96 = vector.shape_cast %95 : vector<1xf32> to vector<1x1x1xf32>
    %97 = vector.extract %96[0, 0, 0] : f32 from vector<1x1x1xf32>
    %98 = vector.broadcast %97 : f32 to vector<1x1xf32>
    %cst_46 = arith.constant 6.250000e-02 : f32
    %99 = vector.broadcast %cst_46 : f32 to vector<1x1xf32>
    %100 = arith.mulf %98, %99 : vector<1x1xf32>
    %101 = arith.truncf %40 : vector<16x32xf32> to vector<16x32xbf16>
    %c0_47 = arith.constant 0 : index
    %c0_48 = arith.constant 0 : index
    %102 = vector.load %arg7[%c0_47, %c0_48] : memref<32x128xbf16, #tpu.memory_space<vmem>>, vector<32x128xbf16>
    %cst_49 = arith.constant dense<0.000000e+00> : vector<16x128xf32>
    %103 = tpu.matmul %101, %102, %cst_49 {dimension_numbers = #tpu.dot_dimension_numbers<[1], [0], [0], [1], [0, 0, 1, 1], [], []>} : vector<16x32xbf16>, vector<32x128xbf16>, vector<16x128xf32> -> vector<16x128xf32>
    %104 = arith.addf %82, %103 : vector<16x128xf32>
    %105 = arith.truncf %76 : vector<16x32xf32> to vector<16x32xbf16>
    %c0_50 = arith.constant 0 : index
    %c0_51 = arith.constant 0 : index
    %106 = vector.load %arg8[%c0_50, %c0_51] : memref<32x128xbf16, #tpu.memory_space<vmem>>, vector<32x128xbf16>
    %cst_52 = arith.constant dense<0.000000e+00> : vector<16x128xf32>
    %107 = tpu.matmul %105, %106, %cst_52 {dimension_numbers = #tpu.dot_dimension_numbers<[1], [0], [0], [1], [0, 0, 1, 1], [], []>} : vector<16x32xbf16>, vector<32x128xbf16>, vector<16x128xf32> -> vector<16x128xf32>
    %108 = arith.addf %104, %107 : vector<16x128xf32>
    %109 = math.tanh %108 : vector<16x128xf32>
    %110 = vector.broadcast %78 : vector<1x128xf32> to vector<16x128xf32>
    %111 = arith.mulf %109, %110 : vector<16x128xf32>
    %112 = vector.shape_cast %111 : vector<16x128xf32> to vector<1x16x128xf32>
    %cst_53 = arith.constant dense<0.000000e+00> : vector<1xf32>
    %113 = vector.multi_reduction <add>, %112, %cst_53 [1, 2] : vector<1x16x128xf32> to vector<1xf32>
    %114 = vector.shape_cast %113 : vector<1xf32> to vector<1x1x1xf32>
    %115 = vector.extract %114[0, 0, 0] : f32 from vector<1x1x1xf32>
    %116 = vector.broadcast %115 : f32 to vector<1x1xf32>
    %cst_54 = arith.constant 6.250000e-02 : f32
    %117 = vector.broadcast %cst_54 : f32 to vector<1x1xf32>
    %118 = arith.mulf %116, %117 : vector<1x1xf32>
    %119 = arith.maximumf %100, %118 : vector<1x1xf32>
    %120 = arith.subf %100, %119 : vector<1x1xf32>
    %121 = math.exp %120 : vector<1x1xf32>
    %122 = arith.subf %118, %119 : vector<1x1xf32>
    %123 = math.exp %122 : vector<1x1xf32>
    %124 = arith.addf %121, %123 : vector<1x1xf32>
    %125 = tpu.reciprocal %124 {approx = true} : vector<1x1xf32> -> vector<1x1xf32>
    %126 = arith.mulf %121, %125 : vector<1x1xf32>
    %127 = arith.mulf %123, %125 : vector<1x1xf32>
    %128 = arith.addf %126, %127 : vector<1x1xf32>
    %129 = vector.broadcast %128 : vector<1x1xf32> to vector<16x32xf32>
    %130 = arith.mulf %1, %129 : vector<16x32xf32>
    %c0_55 = arith.constant 0 : index
    %c0_56 = arith.constant 0 : index
    %131 = vector.load %arg21[%c0_55, %c0_56] : memref<16x96xf32, #tpu.memory_space<vmem>>, vector<16x32xf32>
    tpu.vector_store %arg21[%c0_55, %c0_56], %130 {strides = array<i32>} : memref<16x96xf32, #tpu.memory_space<vmem>>, vector<16x32xf32>,
    %132 = vector.broadcast %126 : vector<1x1xf32> to vector<16x32xf32>
    %133 = arith.mulf %132, %24 : vector<16x32xf32>
    %134 = vector.broadcast %127 : vector<1x1xf32> to vector<16x32xf32>
    %135 = arith.mulf %134, %40 : vector<16x32xf32>
    %136 = arith.addf %133, %135 : vector<16x32xf32>
    %c0_57 = arith.constant 0 : index
    %c32 = arith.constant 32 : index
    %137 = vector.load %arg21[%c0_57, %c32] : memref<16x96xf32, #tpu.memory_space<vmem>>, vector<16x32xf32>
    tpu.vector_store %arg21[%c0_57, %c32], %136 {strides = array<i32>} : memref<16x96xf32, #tpu.memory_space<vmem>>, vector<16x32xf32>,
    %138 = vector.broadcast %126 : vector<1x1xf32> to vector<16x32xf32>
    %139 = arith.mulf %138, %58 : vector<16x32xf32>
    %140 = vector.broadcast %127 : vector<1x1xf32> to vector<16x32xf32>
    %141 = arith.mulf %140, %76 : vector<16x32xf32>
    %142 = arith.addf %139, %141 : vector<16x32xf32>
    %c0_58 = arith.constant 0 : index
    %c64 = arith.constant 64 : index
    %143 = vector.load %arg21[%c0_58, %c64] : memref<16x96xf32, #tpu.memory_space<vmem>>, vector<16x32xf32>
    tpu.vector_store %arg21[%c0_58, %c64], %142 {strides = array<i32>} : memref<16x96xf32, #tpu.memory_space<vmem>>, vector<16x32xf32>,
    %c0_59 = arith.constant 0 : index
    %c0_60 = arith.constant 0 : index
    %144 = vector.load %arg12[%c0_59, %c0_60] : memref<24x32xf32, #tpu.memory_space<vmem>>, vector<24x32xf32>
    %145 = arith.truncf %144 : vector<24x32xf32> to vector<24x32xbf16>
    %c0_61 = arith.constant 0 : index
    %c0_62 = arith.constant 0 : index
    %c0_63 = arith.constant 0 : index
    %146 = vector.load %arg11[%c0_61, %c0_62, %c0_63] : memref<2x24x24xbf16, #tpu.memory_space<vmem>>, vector<1x24x24xbf16>
    %147 = vector.shape_cast %146 : vector<1x24x24xbf16> to vector<24x24xbf16>
    %c1_64 = arith.constant 1 : index
    %c0_65 = arith.constant 0 : index
    %c0_66 = arith.constant 0 : index
    %148 = vector.load %arg11[%c1_64, %c0_65, %c0_66] : memref<2x24x24xbf16, #tpu.memory_space<vmem>>, vector<1x24x24xbf16>
    %149 = vector.shape_cast %148 : vector<1x24x24xbf16> to vector<24x24xbf16>
    %c0_67 = arith.constant 0 : index
    %c0_68 = arith.constant 0 : index
    %150 = vector.load %arg13[%c0_67, %c0_68] : memref<32x64xbf16, #tpu.memory_space<vmem>>, vector<32x64xbf16>
    %cst_69 = arith.constant dense<0.000000e+00> : vector<24x64xf32>
    %151 = tpu.matmul %145, %150, %cst_69 {dimension_numbers = #tpu.dot_dimension_numbers<[1], [0], [0], [1], [0, 0, 1, 1], [], []>} : vector<24x32xbf16>, vector<32x64xbf16>, vector<24x64xf32> -> vector<24x64xf32>
    %152 = vector.extract_strided_slice %151 {offsets = [0, 0], sizes = [24, 32], strides = [1, 1]} : vector<24x64xf32> to vector<24x32xf32>
    %153 = arith.truncf %152 : vector<24x32xf32> to vector<24x32xbf16>
    %cst_70 = arith.constant dense<0.000000e+00> : vector<24x32xf32>
    %154 = tpu.matmul %147, %153, %cst_70 {dimension_numbers = #tpu.dot_dimension_numbers<[1], [0], [0], [1], [0, 0, 1, 1], [], []>} : vector<24x24xbf16>, vector<24x32xbf16>, vector<24x32xf32> -> vector<24x32xf32>
    %cst_71 = arith.constant 0.000000e+00 : f32
    %155 = vector.broadcast %cst_71 : f32 to vector<24x32xf32>
    %156 = arith.cmpf oge, %154, %155 : vector<24x32xf32>
    %157 = vector.broadcast %0 : f32 to vector<24x32xf32>
    %158 = arith.mulf %157, %154 : vector<24x32xf32>
    %159 = arith.select %156, %154, %158 : vector<24x32xi1>, vector<24x32xf32>
    %160 = arith.mulf %159, %159 : vector<24x32xf32>
    %cst_72 = arith.constant dense<0.000000e+00> : vector<24xf32>
    %161 = vector.multi_reduction <add>, %160, %cst_72 [1] : vector<24x32xf32> to vector<24xf32>
    %162 = vector.shape_cast %161 : vector<24xf32> to vector<24x1xf32>
    %cst_73 = arith.constant 1.000000e-24 : f32
    %163 = vector.broadcast %cst_73 : f32 to vector<24x1xf32>
    %164 = arith.maximumf %162, %163 : vector<24x1xf32>
    %165 = math.rsqrt %164 : vector<24x1xf32>
    %166 = vector.broadcast %165 : vector<24x1xf32> to vector<24x32xf32>
    %167 = arith.mulf %159, %166 : vector<24x32xf32>
    %168 = vector.extract_strided_slice %151 {offsets = [0, 32], sizes = [24, 32], strides = [1, 1]} : vector<24x64xf32> to vector<24x32xf32>
    %169 = arith.truncf %168 : vector<24x32xf32> to vector<24x32xbf16>
    %cst_74 = arith.constant dense<0.000000e+00> : vector<24x32xf32>
    %170 = tpu.matmul %149, %169, %cst_74 {dimension_numbers = #tpu.dot_dimension_numbers<[1], [0], [0], [1], [0, 0, 1, 1], [], []>} : vector<24x24xbf16>, vector<24x32xbf16>, vector<24x32xf32> -> vector<24x32xf32>
    %cst_75 = arith.constant 0.000000e+00 : f32
    %171 = vector.broadcast %cst_75 : f32 to vector<24x32xf32>
    %172 = arith.cmpf oge, %170, %171 : vector<24x32xf32>
    %173 = vector.broadcast %0 : f32 to vector<24x32xf32>
    %174 = arith.mulf %173, %170 : vector<24x32xf32>
    %175 = arith.select %172, %170, %174 : vector<24x32xi1>, vector<24x32xf32>
    %176 = arith.mulf %175, %175 : vector<24x32xf32>
    %cst_76 = arith.constant dense<0.000000e+00> : vector<24xf32>
    %177 = vector.multi_reduction <add>, %176, %cst_76 [1] : vector<24x32xf32> to vector<24xf32>
    %178 = vector.shape_cast %177 : vector<24xf32> to vector<24x1xf32>
    %cst_77 = arith.constant 1.000000e-24 : f32
    %179 = vector.broadcast %cst_77 : f32 to vector<24x1xf32>
    %180 = arith.maximumf %178, %179 : vector<24x1xf32>
    %181 = math.rsqrt %180 : vector<24x1xf32>
    %182 = vector.broadcast %181 : vector<24x1xf32> to vector<24x32xf32>
    %183 = arith.mulf %175, %182 : vector<24x32xf32>
    %c0_78 = arith.constant 0 : index
    %c0_79 = arith.constant 0 : index
    %184 = vector.load %arg14[%c0_78, %c0_79] : memref<32x32xbf16, #tpu.memory_space<vmem>>, vector<32x32xbf16>
    %185 = arith.truncf %159 : vector<24x32xf32> to vector<24x32xbf16>
    %cst_80 = arith.constant dense<0.000000e+00> : vector<24x32xf32>
    %186 = tpu.matmul %185, %184, %cst_80 {dimension_numbers = #tpu.dot_dimension_numbers<[1], [0], [0], [1], [0, 0, 1, 1], [], []>} : vector<24x32xbf16>, vector<32x32xbf16>, vector<24x32xf32> -> vector<24x32xf32>
    %187 = arith.truncf %186 : vector<24x32xf32> to vector<24x32xbf16>
    %cst_81 = arith.constant dense<0.000000e+00> : vector<24x32xf32>
    %188 = tpu.matmul %147, %187, %cst_81 {dimension_numbers = #tpu.dot_dimension_numbers<[1], [0], [0], [1], [0, 0, 1, 1], [], []>} : vector<24x24xbf16>, vector<24x32xbf16>, vector<24x32xf32> -> vector<24x32xf32>
    %cst_82 = arith.constant 0.000000e+00 : f32
    %189 = vector.broadcast %cst_82 : f32 to vector<24x32xf32>
    %190 = arith.cmpf oge, %188, %189 : vector<24x32xf32>
    %191 = vector.broadcast %0 : f32 to vector<24x32xf32>
    %192 = arith.mulf %191, %188 : vector<24x32xf32>
    %193 = arith.select %190, %188, %192 : vector<24x32xi1>, vector<24x32xf32>
    %194 = arith.mulf %193, %193 : vector<24x32xf32>
    %cst_83 = arith.constant dense<0.000000e+00> : vector<24xf32>
    %195 = vector.multi_reduction <add>, %194, %cst_83 [1] : vector<24x32xf32> to vector<24xf32>
    %196 = vector.shape_cast %195 : vector<24xf32> to vector<24x1xf32>
    %cst_84 = arith.constant 1.000000e-24 : f32
    %197 = vector.broadcast %cst_84 : f32 to vector<24x1xf32>
    %198 = arith.maximumf %196, %197 : vector<24x1xf32>
    %199 = math.rsqrt %198 : vector<24x1xf32>
    %200 = vector.broadcast %199 : vector<24x1xf32> to vector<24x32xf32>
    %201 = arith.mulf %193, %200 : vector<24x32xf32>
    %c0_85 = arith.constant 0 : index
    %c0_86 = arith.constant 0 : index
    %202 = vector.load %arg15[%c0_85, %c0_86] : memref<32x32xbf16, #tpu.memory_space<vmem>>, vector<32x32xbf16>
    %203 = arith.truncf %175 : vector<24x32xf32> to vector<24x32xbf16>
    %cst_87 = arith.constant dense<0.000000e+00> : vector<24x32xf32>
    %204 = tpu.matmul %203, %202, %cst_87 {dimension_numbers = #tpu.dot_dimension_numbers<[1], [0], [0], [1], [0, 0, 1, 1], [], []>} : vector<24x32xbf16>, vector<32x32xbf16>, vector<24x32xf32> -> vector<24x32xf32>
    %205 = arith.truncf %204 : vector<24x32xf32> to vector<24x32xbf16>
    %cst_88 = arith.constant dense<0.000000e+00> : vector<24x32xf32>
    %206 = tpu.matmul %149, %205, %cst_88 {dimension_numbers = #tpu.dot_dimension_numbers<[1], [0], [0], [1], [0, 0, 1, 1], [], []>} : vector<24x24xbf16>, vector<24x32xbf16>, vector<24x32xf32> -> vector<24x32xf32>
    %cst_89 = arith.constant 0.000000e+00 : f32
    %207 = vector.broadcast %cst_89 : f32 to vector<24x32xf32>
    %208 = arith.cmpf oge, %206, %207 : vector<24x32xf32>
    %209 = vector.broadcast %0 : f32 to vector<24x32xf32>
    %210 = arith.mulf %209, %206 : vector<24x32xf32>
    %211 = arith.select %208, %206, %210 : vector<24x32xi1>, vector<24x32xf32>
    %212 = arith.mulf %211, %211 : vector<24x32xf32>
    %cst_90 = arith.constant dense<0.000000e+00> : vector<24xf32>
    %213 = vector.multi_reduction <add>, %212, %cst_90 [1] : vector<24x32xf32> to vector<24xf32>
    %214 = vector.shape_cast %213 : vector<24xf32> to vector<24x1xf32>
    %cst_91 = arith.constant 1.000000e-24 : f32
    %215 = vector.broadcast %cst_91 : f32 to vector<24x1xf32>
    %216 = arith.maximumf %214, %215 : vector<24x1xf32>
    %217 = math.rsqrt %216 : vector<24x1xf32>
    %218 = vector.broadcast %217 : vector<24x1xf32> to vector<24x32xf32>
    %219 = arith.mulf %211, %218 : vector<24x32xf32>
    %c0_92 = arith.constant 0 : index
    %c0_93 = arith.constant 0 : index
    %220 = vector.load %arg19[%c0_92, %c0_93] : memref<1x128xf32, #tpu.memory_space<vmem>>, vector<1x128xf32>
    %c0_94 = arith.constant 0 : index
    %c0_95 = arith.constant 0 : index
    %221 = vector.load %arg20[%c0_94, %c0_95] : memref<1x128xf32, #tpu.memory_space<vmem>>, vector<1x128xf32>
    %c0_96 = arith.constant 0 : index
    %c0_97 = arith.constant 0 : index
    %222 = vector.load %arg16[%c0_96, %c0_97] : memref<32x128xbf16, #tpu.memory_space<vmem>>, vector<32x128xbf16>
    %cst_98 = arith.constant dense<0.000000e+00> : vector<24x128xf32>
    %223 = tpu.matmul %145, %222, %cst_98 {dimension_numbers = #tpu.dot_dimension_numbers<[1], [0], [0], [1], [0, 0, 1, 1], [], []>} : vector<24x32xbf16>, vector<32x128xbf16>, vector<24x128xf32> -> vector<24x128xf32>
    %224 = vector.broadcast %220 : vector<1x128xf32> to vector<24x128xf32>
    %225 = arith.addf %223, %224 : vector<24x128xf32>
    %226 = arith.truncf %167 : vector<24x32xf32> to vector<24x32xbf16>
    %c0_99 = arith.constant 0 : index
    %c0_100 = arith.constant 0 : index
    %227 = vector.load %arg17[%c0_99, %c0_100] : memref<32x128xbf16, #tpu.memory_space<vmem>>, vector<32x128xbf16>
    %cst_101 = arith.constant dense<0.000000e+00> : vector<24x128xf32>
    %228 = tpu.matmul %226, %227, %cst_101 {dimension_numbers = #tpu.dot_dimension_numbers<[1], [0], [0], [1], [0, 0, 1, 1], [], []>} : vector<24x32xbf16>, vector<32x128xbf16>, vector<24x128xf32> -> vector<24x128xf32>
    %229 = arith.addf %225, %228 : vector<24x128xf32>
    %230 = arith.truncf %201 : vector<24x32xf32> to vector<24x32xbf16>
    %c0_102 = arith.constant 0 : index
    %c0_103 = arith.constant 0 : index
    %231 = vector.load %arg18[%c0_102, %c0_103] : memref<32x128xbf16, #tpu.memory_space<vmem>>, vector<32x128xbf16>
    %cst_104 = arith.constant dense<0.000000e+00> : vector<24x128xf32>
    %232 = tpu.matmul %230, %231, %cst_104 {dimension_numbers = #tpu.dot_dimension_numbers<[1], [0], [0], [1], [0, 0, 1, 1], [], []>} : vector<24x32xbf16>, vector<32x128xbf16>, vector<24x128xf32> -> vector<24x128xf32>
    %233 = arith.addf %229, %232 : vector<24x128xf32>
    %234 = math.tanh %233 : vector<24x128xf32>
    %235 = vector.broadcast %221 : vector<1x128xf32> to vector<24x128xf32>
    %236 = arith.mulf %234, %235 : vector<24x128xf32>
    %237 = vector.shape_cast %236 : vector<24x128xf32> to vector<1x24x128xf32>
    %cst_105 = arith.constant dense<0.000000e+00> : vector<1xf32>
    %238 = vector.multi_reduction <add>, %237, %cst_105 [1, 2] : vector<1x24x128xf32> to vector<1xf32>
    %239 = vector.shape_cast %238 : vector<1xf32> to vector<1x1x1xf32>
    %240 = vector.extract %239[0, 0, 0] : f32 from vector<1x1x1xf32>
    %241 = vector.broadcast %240 : f32 to vector<1x1xf32>
    %cst_106 = arith.constant 0.0416666679 : f32
    %242 = vector.broadcast %cst_106 : f32 to vector<1x1xf32>
    %243 = arith.mulf %241, %242 : vector<1x1xf32>
    %244 = arith.truncf %183 : vector<24x32xf32> to vector<24x32xbf16>
    %c0_107 = arith.constant 0 : index
    %c0_108 = arith.constant 0 : index
    %245 = vector.load %arg17[%c0_107, %c0_108] : memref<32x128xbf16, #tpu.memory_space<vmem>>, vector<32x128xbf16>
    %cst_109 = arith.constant dense<0.000000e+00> : vector<24x128xf32>
    %246 = tpu.matmul %244, %245, %cst_109 {dimension_numbers = #tpu.dot_dimension_numbers<[1], [0], [0], [1], [0, 0, 1, 1], [], []>} : vector<24x32xbf16>, vector<32x128xbf16>, vector<24x128xf32> -> vector<24x128xf32>
    %247 = arith.addf %225, %246 : vector<24x128xf32>
    %248 = arith.truncf %219 : vector<24x32xf32> to vector<24x32xbf16>
    %c0_110 = arith.constant 0 : index
    %c0_111 = arith.constant 0 : index
    %249 = vector.load %arg18[%c0_110, %c0_111] : memref<32x128xbf16, #tpu.memory_space<vmem>>, vector<32x128xbf16>
    %cst_112 = arith.constant dense<0.000000e+00> : vector<24x128xf32>
    %250 = tpu.matmul %248, %249, %cst_112 {dimension_numbers = #tpu.dot_dimension_numbers<[1], [0], [0], [1], [0, 0, 1, 1], [], []>} : vector<24x32xbf16>, vector<32x128xbf16>, vector<24x128xf32> -> vector<24x128xf32>
    %251 = arith.addf %247, %250 : vector<24x128xf32>
    %252 = math.tanh %251 : vector<24x128xf32>
    %253 = vector.broadcast %221 : vector<1x128xf32> to vector<24x128xf32>
    %254 = arith.mulf %252, %253 : vector<24x128xf32>
    %255 = vector.shape_cast %254 : vector<24x128xf32> to vector<1x24x128xf32>
    %cst_113 = arith.constant dense<0.000000e+00> : vector<1xf32>
    %256 = vector.multi_reduction <add>, %255, %cst_113 [1, 2] : vector<1x24x128xf32> to vector<1xf32>
    %257 = vector.shape_cast %256 : vector<1xf32> to vector<1x1x1xf32>
    %258 = vector.extract %257[0, 0, 0] : f32 from vector<1x1x1xf32>
    %259 = vector.broadcast %258 : f32 to vector<1x1xf32>
    %cst_114 = arith.constant 0.0416666679 : f32
    %260 = vector.broadcast %cst_114 : f32 to vector<1x1xf32>
    %261 = arith.mulf %259, %260 : vector<1x1xf32>
    %262 = arith.maximumf %243, %261 : vector<1x1xf32>
    %263 = arith.subf %243, %262 : vector<1x1xf32>
    %264 = math.exp %263 : vector<1x1xf32>
    %265 = arith.subf %261, %262 : vector<1x1xf32>
    %266 = math.exp %265 : vector<1x1xf32>
    %267 = arith.addf %264, %266 : vector<1x1xf32>
    %268 = tpu.reciprocal %267 {approx = true} : vector<1x1xf32> -> vector<1x1xf32>
    %269 = arith.mulf %264, %268 : vector<1x1xf32>
    %270 = arith.mulf %266, %268 : vector<1x1xf32>
    %271 = arith.addf %269, %270 : vector<1x1xf32>
    %272 = vector.broadcast %271 : vector<1x1xf32> to vector<24x32xf32>
    %273 = arith.mulf %144, %272 : vector<24x32xf32>
    %c0_115 = arith.constant 0 : index
    %c0_116 = arith.constant 0 : index
    %274 = vector.load %arg22[%c0_115, %c0_116] : memref<24x96xf32, #tpu.memory_space<vmem>>, vector<24x32xf32>
    tpu.vector_store %arg22[%c0_115, %c0_116], %273 {strides = array<i32>} : memref<24x96xf32, #tpu.memory_space<vmem>>, vector<24x32xf32>,
    %275 = vector.broadcast %269 : vector<1x1xf32> to vector<24x32xf32>
    %276 = arith.mulf %275, %167 : vector<24x32xf32>
    %277 = vector.broadcast %270 : vector<1x1xf32> to vector<24x32xf32>
    %278 = arith.mulf %277, %183 : vector<24x32xf32>
    %279 = arith.addf %276, %278 : vector<24x32xf32>
    %c0_117 = arith.constant 0 : index
    %c32_118 = arith.constant 32 : index
    %280 = vector.load %arg22[%c0_117, %c32_118] : memref<24x96xf32, #tpu.memory_space<vmem>>, vector<24x32xf32>
    tpu.vector_store %arg22[%c0_117, %c32_118], %279 {strides = array<i32>} : memref<24x96xf32, #tpu.memory_space<vmem>>, vector<24x32xf32>,
    %281 = vector.broadcast %269 : vector<1x1xf32> to vector<24x32xf32>
    %282 = arith.mulf %281, %201 : vector<24x32xf32>
    %283 = vector.broadcast %270 : vector<1x1xf32> to vector<24x32xf32>
    %284 = arith.mulf %283, %219 : vector<24x32xf32>
    %285 = arith.addf %282, %284 : vector<24x32xf32>
    %c0_119 = arith.constant 0 : index
    %c64_120 = arith.constant 64 : index
    %286 = vector.load %arg22[%c0_119, %c64_120] : memref<24x96xf32, #tpu.memory_space<vmem>>, vector<24x32xf32>
    tpu.vector_store %arg22[%c0_119, %c64_120], %285 {strides = array<i32>} : memref<24x96xf32, #tpu.memory_space<vmem>>, vector<24x32xf32>,
    return
  }
}

</mosaic_0001>

<bundles_post_ra>
// kernel: tpu_custom_call.1
= control target key start
LH: loop header
LB: loop body
LE: loop exit
PB: predicated region body
PF: predicated region fallthrough
CT: control target
= control target key end

     0   :  { %s3897_s0 = inlined_call_operand.<no memory space> [shape: f32[1,1], index: 0, kind: input, shape index: {}]   ;;  %s3898_s1 = inlined_call_operand.hbm [shape: bf16[2,16,16], index: 1, kind: input, shape index: {}]   ;;  %s3899_s2 = inlined_call_operand.hbm [shape: f32[16,32], index: 2, kind: input, shape index: {}]   ;;  %s3900_s3 = inlined_call_operand.hbm [shape: bf16[32,64], index: 3, kind: input, shape index: {}]   ;;  %s3901_s4 = inlined_call_operand.hbm [shape: bf16[32,32], index: 4, kind: input, shape index: {}]   ;;  %s3902_s5 = inlined_call_operand.vmem [shape: bf16[32,32], index: 5, kind: input, shape index: {}]   ;;  %s3903_s6 = inlined_call_operand.hbm [shape: bf16[32,128], index: 6, kind: input, shape index: {}]   ;;  %s3904_s7 = inlined_call_operand.hbm [shape: bf16[32,128], index: 7, kind: input, shape index: {}]   ;;  %s3905_s8 = inlined_call_operand.hbm [shape: bf16[32,128], index: 8, kind: input, shape index: {}]   ;;  %s3906_s9 = inlined_call_operand.hbm [shape: f32[1,128], index: 9, kind: input, shape index: {}]   ;;  %s3907_s10 = inlined_call_operand.hbm [shape: f32[1,128], index: 10, kind: input, shape index: {}]   ;;  %s3908_s11 = inlined_call_operand.vmem [shape: bf16[2,24,24], index: 11, kind: input, shape index: {}]   ;;  %s3909_s12 = inlined_call_operand.hbm [shape: f32[24,32], index: 12, kind: input, shape index: {}]   ;;  %s3910_s13 = inlined_call_operand.hbm [shape: bf16[32,64], index: 13, kind: input, shape index: {}]   ;;  %s3911_s14 = inlined_call_operand.hbm [shape: bf16[32,32], index: 14, kind: input, shape index: {}]   ;;  %s3912_s15 = inlined_call_operand.vmem [shape: bf16[32,32], index: 15, kind: input, shape index: {}]   ;;  %s3913_s16 = inlined_call_operand.hbm [shape: bf16[32,128], index: 16, kind: input, shape index: {}]   ;;  %s3914_s17 = inlined_call_operand.hbm [shape: bf16[32,128], index: 17, kind: input, shape index: {}]   ;;  %s3915_s18 = inlined_call_operand.hbm [shape: bf16[32,128], index: 18, kind: input, shape index: {}]   ;;  %s3916_s19 = inlined_call_operand.vmem [shape: f32[1,128], index: 19, kind: input, shape index: {}]   ;;  %s3917_s20 = inlined_call_operand.vmem [shape: f32[1,128], index: 20, kind: input, shape index: {}]   ;;  %s3918_s21 = inlined_call_operand.hbm [shape: f32[16,96], index: 21, kind: output, shape index: {0}]   ;;  %s3919_s22 = inlined_call_operand.hbm [shape: f32[24,96], index: 22, kind: output, shape index: {1}]  }
   0x1   :  { %3928 = sst [smem:[#allocation40_spill]] %s3897_s0 }
   0x2   :  { %3929 = sst [smem:[#allocation41_spill]] %s3898_s1 }
   0x3   :  { %3930 = sst [smem:[#allocation42_spill]] %s3899_s2 }
   0x4   :  { %3931 = sst [smem:[#allocation43_spill]] %s3900_s3 }
   0x5   :  { %3932 = sst [smem:[#allocation44_spill]] %s3901_s4 }
   0x6   :  { %3933 = sst [smem:[#allocation45_spill]] %s3902_s5 }
   0x7   :  { %3934 = sst [smem:[#allocation46_spill]] %s3903_s6 }
   0x8   :  { %3935 = sst [smem:[#allocation47_spill]] %s3917_s20 }
   0x9   :  { %3936 = sst [smem:[#allocation48_spill]] %s3918_s21 }
   0xa   :  { %3937 = sst [smem:[#allocation49_spill]] %s3919_s22 }
   0xb   :  { %29 = vsyncpa [#allocation4], 0 }
   0xc   :  { %30 = vsyncpa [#allocation7], 0 }
   0xd   :  { %31 = vsyncpa [#allocation10], 0 }
   0xe   :  { %32 = vsyncpa [#allocation13], 0 }
   0xf   :  { %33 = vsyncpa [#allocation16], 0 }
  0x10   :  { %34 = vsyncpa [#allocation19], 0 }
  0x11   :  { %35 = vsyncpa [#allocation22], 0 }
  0x12   :  { %36 = vsyncpa [#allocation25], 0 }
  0x13   :  { %37 = vsyncpa [#allocation5], 0 }
  0x14   :  { %38 = vsyncpa [#allocation29], 0  ;;  %s3090_s3 = smov [#allocation6]   ;;  %s3938_s4 = sld [smem:[#allocation42_spill]] }
  0x15   :  { %s58_s28 = sshll.u32 %s3090_s3, 4  ;;  %s59_s28 = int_to_ptr.vmem [resolvable:$true] %s58_s28 }
  0x1a   :  { %s2696_s0 = scalar_lea.hbm %s3938_s4, 256 }
  0x1b   :  { %p2697_p0 = scmp.ne.s32.totalorder %s3938_s4, %s2696_s0  ;;  %p2700_p1 = scmp.lt.u32.totalorder %s2696_s0, %s3938_s4 }
  0x1d   :  { %p2702_p2 = pnand %p2700_p1, %p2697_p0 }
  0x1f   :  { %2705 = shalt.err (!%p2702_p2)
}
  0x20   :  { %s2706_s6 = scalar_lea.vmem %s59_s28, 256  ;;  %p2711_p4 = scmp.lt.s32.totalorder %s59_s28, %s59_s28 }
  0x21   :  { %p2707_p3 = scmp.ne.s32.totalorder %s59_s28, %s2706_s6  ;;  %p2712_p5 = scmp.lt.s32.totalorder %s2706_s6, %s2706_s6 }
  0x23   :  { %p2713_p6 = por %p2712_p5, %p2711_p4 }
  0x25   :  { %p2714_p7 = pnand %p2713_p6, %p2707_p3 }
  0x27   :  { %2717 = shalt.err (!%p2714_p7)
}
  0x28   :  { %s3091_s25 = smov 128   ;;  %s3092_s26 = smov 8  }
  0x29   :  { %64 = dma.hbm_to_vmem [thread:$0]  %s3938_s4, 256, %s59_s28, [#allocation7], %s3091_s25, %s3091_s25, %s3092_s26  }
  0x2a   :  { %s3093_s3 = smov [#allocation9]   ;;  %s3094_s30 = smov [#allocation12]  }
  0x2b   :  { %s82_s29 = sshll.u32 %s3093_s3, 4  ;;  %s108_s0 = sshll.u32 %s3094_s30, 4  ;;  %s83_s29 = int_to_ptr.vmem [resolvable:$true] %s82_s29  ;;  %s109_s0 = int_to_ptr.vmem [resolvable:$true] %s108_s0 }
  0x2c   :  { %s3939_s5 = sld [smem:[#allocation44_spill]] }
  0x32   :  { %s2718_s24 = scalar_lea.hbm %s3939_s5, 256 }
  0x33   :  { %p2719_p8 = scmp.ne.s32.totalorder %s3939_s5, %s2718_s24  ;;  %p2722_p9 = scmp.lt.u32.totalorder %s2718_s24, %s3939_s5 }
  0x35   :  { %p2724_p10 = pnand %p2722_p9, %p2719_p8 }
  0x37   :  { %2727 = shalt.err (!%p2724_p10)
}
  0x38   :  { %s2728_s28 = scalar_lea.vmem %s83_s29, 256  ;;  %p2733_p12 = scmp.lt.s32.totalorder %s83_s29, %s83_s29 }
  0x39   :  { %p2729_p11 = scmp.ne.s32.totalorder %s83_s29, %s2728_s28  ;;  %p2734_p13 = scmp.lt.s32.totalorder %s2728_s28, %s2728_s28 }
  0x3b   :  { %p2735_p0 = por %p2734_p13, %p2733_p12 }
  0x3d   :  { %p2736_p1 = pnand %p2735_p0, %p2729_p11 }
  0x3f   :  { %2739 = shalt.err (!%p2736_p1)
}
  0x40   :  { %s3095_s4 = smov 64   ;;  %s3096_s2 = smov 4  }
  0x41   :  { %88 = dma.hbm_to_vmem [thread:$0]  %s3939_s5, 256, %s83_s29, [#allocation10], %s3095_s4, %s3095_s4, %s3096_s2  }
  0x42   :  { %s2740_s3 = scalar_lea.hbm %s3904_s7, 256 }
  0x43   :  { %p2741_p2 = scmp.ne.s32.totalorder %s3904_s7, %s2740_s3  ;;  %p2744_p3 = scmp.lt.u32.totalorder %s2740_s3, %s3904_s7 }
  0x45   :  { %p2746_p4 = pnand %p2744_p3, %p2741_p2 }
  0x47   :  { %2749 = shalt.err (!%p2746_p4)
}
  0x48   :  { %s2750_s6 = scalar_lea.vmem %s109_s0, 256  ;;  %p2755_p6 = scmp.lt.s32.totalorder %s109_s0, %s109_s0 }
  0x49   :  { %p2751_p5 = scmp.ne.s32.totalorder %s109_s0, %s2750_s6  ;;  %p2756_p7 = scmp.lt.s32.totalorder %s2750_s6, %s2750_s6 }
  0x4b   :  { %p2757_p8 = por %p2756_p7, %p2755_p6 }
  0x4d   :  { %p2758_p9 = pnand %p2757_p8, %p2751_p5 }
  0x4f   :  { %2761 = shalt.err (!%p2758_p9)
}
  0x50   :  { %114 = dma.hbm_to_vmem [thread:$0]  %s3904_s7, 256, %s109_s0, [#allocation13], %s3095_s4, %s3095_s4, %s3096_s2  }
  0x51   :  { %s3097_s28 = smov [#allocation15]   ;;  %s3098_s27 = smov [#allocation18]  }
  0x52   :  { %s133_s22 = sshll.u32 %s3097_s28, 4  ;;  %s154_s20 = sshll.u32 %s3098_s27, 4  ;;  %s134_s22 = int_to_ptr.vmem [resolvable:$true] %s133_s22  ;;  %s155_s20 = int_to_ptr.vmem [resolvable:$true] %s154_s20 }
  0x53   :  { %s2762_s30 = scalar_lea.hbm %s3906_s9, 16 }
  0x54   :  { %p2763_p10 = scmp.ne.s32.totalorder %s3906_s9, %s2762_s30  ;;  %p2766_p11 = scmp.lt.u32.totalorder %s2762_s30, %s3906_s9 }
  0x56   :  { %p2768_p12 = pnand %p2766_p11, %p2763_p10 }
  0x58   :  { %2771 = shalt.err (!%p2768_p12)
}
  0x59   :  { %s2772_s7 = scalar_lea.vmem %s134_s22, 16  ;;  %s2776_s0 = scalar_lea.vmem %s134_s22, 32 }
  0x5a   :  { %p2773_p13 = scmp.ne.s32.totalorder %s134_s22, %s2772_s7  ;;  %p2777_p0 = scmp.lt.s32.totalorder %s134_s22, %s134_s22 }
  0x5b   :  { %p2778_p1 = scmp.lt.s32.totalorder %s2776_s0, %s2772_s7 }
  0x5d   :  { %p2779_p2 = por %p2778_p1, %p2777_p0 }
  0x5f   :  { %p2780_p3 = pnand %p2779_p2, %p2773_p13 }
  0x61   :  { %2783 = shalt.err (!%p2780_p3)
}
  0x62   :  { %136 = dma.hbm_to_vmem [thread:$0]  %s3906_s9, 16, %s134_s22, [#allocation16]  }
  0x63   :  { %s2784_s21 = scalar_lea.hbm %s3909_s12, 384 }
  0x64   :  { %p2785_p4 = scmp.ne.s32.totalorder %s3909_s12, %s2784_s21  ;;  %p2788_p5 = scmp.lt.u32.totalorder %s2784_s21, %s3909_s12 }
  0x66   :  { %p2790_p6 = pnand %p2788_p5, %p2785_p4 }
  0x68   :  { %2793 = shalt.err (!%p2790_p6)
}
  0x69   :  { %s2794_s24 = scalar_lea.vmem %s155_s20, 384  ;;  %p2799_p8 = scmp.lt.s32.totalorder %s155_s20, %s155_s20 }
  0x6a   :  { %p2795_p7 = scmp.ne.s32.totalorder %s155_s20, %s2794_s24  ;;  %p2800_p9 = scmp.lt.s32.totalorder %s2794_s24, %s2794_s24 }
  0x6c   :  { %p2801_p10 = por %p2800_p9, %p2799_p8 }
  0x6e   :  { %p2802_p11 = pnand %p2801_p10, %p2795_p7 }
  0x70   :  { %2805 = shalt.err (!%p2802_p11)
}
  0x71   :  { %160 = dma.hbm_to_vmem [thread:$0]  %s3909_s12, 384, %s155_s20, [#allocation19], %s3091_s25, %s3091_s25, %s3092_s26  }
  0x72   :  { %s3099_s6 = smov [#allocation21]   ;;  %s3100_s0 = smov [#allocation24]  }
  0x73   :  { %s178_s7 = sshll.u32 %s3099_s6, 4  ;;  %s204_s29 = sshll.u32 %s3100_s0, 4  ;;  %s179_s7 = int_to_ptr.vmem [resolvable:$true] %s178_s7  ;;  %s205_s29 = int_to_ptr.vmem [resolvable:$true] %s204_s29 }
  0x74   :  { %s2806_s27 = scalar_lea.hbm %s3911_s14, 256 }
  0x75   :  { %p2807_p12 = scmp.ne.s32.totalorder %s3911_s14, %s2806_s27  ;;  %p2810_p13 = scmp.lt.u32.totalorder %s2806_s27, %s3911_s14 }
  0x77   :  { %p2812_p0 = pnand %p2810_p13, %p2807_p12 }
  0x79   :  { %2815 = shalt.err (!%p2812_p0)
}
  0x7a   :  { %s2816_s12 = scalar_lea.vmem %s179_s7, 256  ;;  %p2821_p2 = scmp.lt.s32.totalorder %s179_s7, %s179_s7 }
  0x7b   :  { %p2817_p1 = scmp.ne.s32.totalorder %s179_s7, %s2816_s12  ;;  %p2822_p3 = scmp.lt.s32.totalorder %s2816_s12, %s2816_s12 }
  0x7d   :  { %p2823_p4 = por %p2822_p3, %p2821_p2 }
  0x7f   :  { %p2824_p5 = pnand %p2823_p4, %p2817_p1 }
  0x81   :  { %2827 = shalt.err (!%p2824_p5)
}
  0x82   :  { %184 = dma.hbm_to_vmem [thread:$0]  %s3911_s14, 256, %s179_s7, [#allocation22], %s3095_s4, %s3095_s4, %s3096_s2  }
  0x83   :  { %s2828_s22 = scalar_lea.hbm %s3914_s17, 256 }
  0x84   :  { %p2829_p6 = scmp.ne.s32.totalorder %s3914_s17, %s2828_s22  ;;  %p2832_p7 = scmp.lt.u32.totalorder %s2828_s22, %s3914_s17 }
  0x86   :  { %p2834_p8 = pnand %p2832_p7, %p2829_p6 }
  0x88   :  { %2837 = shalt.err (!%p2834_p8)
}
  0x89   :  { %s2838_s27 = scalar_lea.vmem %s205_s29, 256  ;;  %p2843_p10 = scmp.lt.s32.totalorder %s205_s29, %s205_s29 }
  0x8a   :  { %p2839_p9 = scmp.ne.s32.totalorder %s205_s29, %s2838_s27  ;;  %p2844_p11 = scmp.lt.s32.totalorder %s2838_s27, %s2838_s27 }
  0x8c   :  { %p2845_p12 = por %p2844_p11, %p2843_p10 }
  0x8e   :  { %p2846_p13 = pnand %p2845_p12, %p2839_p9 }
  0x90   :  { %2849 = shalt.err (!%p2846_p13)
}
  0x91   :  { %210 = dma.hbm_to_vmem [thread:$0]  %s3914_s17, 256, %s205_s29, [#allocation25], %s3095_s4, %s3095_s4, %s3096_s2  }
  0x92   :  { %s3101_s21 = smov [#allocation3]   ;;  %s3102_s30 = smov [#allocation8]  }
  0x93   :  { %s46_s3 = sshll.u32 %s3101_s21, 4  ;;  %s70_s23 = sshll.u32 %s3102_s30, 4  ;;  %s47_s3 = int_to_ptr.vmem [resolvable:$true] %s46_s3  ;;  %s71_s23 = int_to_ptr.vmem [resolvable:$true] %s70_s23 }
  0x94   :  { %s3940_s1 = sld [smem:[#allocation41_spill]] }
  0x9a   :  { %s2850_s24 = scalar_lea.hbm %s3940_s1, 256 }
  0x9b   :  { %p2851_p0 = scmp.ne.s32.totalorder %s3940_s1, %s2850_s24  ;;  %p2854_p1 = scmp.lt.u32.totalorder %s2850_s24, %s3940_s1 }
  0x9d   :  { %p2856_p2 = pnand %p2854_p1, %p2851_p0 }
  0x9f   :  { %2859 = shalt.err (!%p2856_p2)
}
  0xa0   :  { %s2860_s17 = scalar_lea.vmem %s47_s3, 256  ;;  %p2865_p4 = scmp.lt.s32.totalorder %s47_s3, %s47_s3 }
  0xa1   :  { %p2861_p3 = scmp.ne.s32.totalorder %s47_s3, %s2860_s17  ;;  %p2866_p5 = scmp.lt.s32.totalorder %s2860_s17, %s2860_s17 }
  0xa3   :  { %p2867_p6 = por %p2866_p5, %p2865_p4 }
  0xa5   :  { %p2868_p7 = pnand %p2867_p6, %p2861_p3 }
  0xa7   :  { %2871 = shalt.err (!%p2868_p7)
}
  0xa8   :  { %52 = dma.hbm_to_vmem [thread:$0]  %s3940_s1, 256, %s47_s3, [#allocation4], %s3095_s4, %s3095_s4, %s3096_s2  }
  0xa9   :  { %s3941_s14 = sld [smem:[#allocation43_spill]] }
  0xaf   :  { %s2872_s7 = scalar_lea.hbm %s3941_s14, 256 }
  0xb0   :  { %p2873_p8 = scmp.ne.s32.totalorder %s3941_s14, %s2872_s7  ;;  %p2876_p9 = scmp.lt.u32.totalorder %s2872_s7, %s3941_s14 }
  0xb2   :  { %p2878_p10 = pnand %p2876_p9, %p2873_p8 }
  0xb4   :  { %2881 = shalt.err (!%p2878_p10)
}
  0xb5   :  { %s2882_s24 = scalar_lea.vmem %s71_s23, 256  ;;  %p2887_p12 = scmp.lt.s32.totalorder %s71_s23, %s71_s23 }
  0xb6   :  { %p2883_p11 = scmp.ne.s32.totalorder %s71_s23, %s2882_s24  ;;  %p2888_p13 = scmp.lt.s32.totalorder %s2882_s24, %s2882_s24 }
  0xb8   :  { %p2889_p0 = por %p2888_p13, %p2887_p12 }
  0xba   :  { %p2890_p1 = pnand %p2889_p0, %p2883_p11 }
  0xbc   :  { %2893 = shalt.err (!%p2890_p1)
}
  0xbd   :  { %76 = dma.hbm_to_vmem [thread:$0]  %s3941_s14, 256, %s71_s23, [#allocation7], %s3095_s4, %s3095_s4, %s3096_s2  }
  0xbe   :  { %s3103_s9 = smov [#allocation11]   ;;  %s3104_s6 = smov [#allocation14]  }
  0xbf   :  { %s96_s22 = sshll.u32 %s3103_s9, 4  ;;  %s120_s0 = sshll.u32 %s3104_s6, 4  ;;  %s97_s22 = int_to_ptr.vmem [resolvable:$true] %s96_s22  ;;  %s121_s0 = int_to_ptr.vmem [resolvable:$true] %s120_s0 }
  0xc0   :  { %s3942_s5 = sld [smem:[#allocation46_spill]] }
  0xc6   :  { %s2894_s28 = scalar_lea.hbm %s3942_s5, 256 }
  0xc7   :  { %p2895_p2 = scmp.ne.s32.totalorder %s3942_s5, %s2894_s28  ;;  %p2898_p3 = scmp.lt.u32.totalorder %s2894_s28, %s3942_s5 }
  0xc9   :  { %p2900_p4 = pnand %p2898_p3, %p2895_p2 }
  0xcb   :  { %2903 = shalt.err (!%p2900_p4)
}
  0xcc   :  { %s2904_s23 = scalar_lea.vmem %s97_s22, 256  ;;  %p2909_p6 = scmp.lt.s32.totalorder %s97_s22, %s97_s22 }
  0xcd   :  { %p2905_p5 = scmp.ne.s32.totalorder %s97_s22, %s2904_s23  ;;  %p2910_p7 = scmp.lt.s32.totalorder %s2904_s23, %s2904_s23 }
  0xcf   :  { %p2911_p8 = por %p2910_p7, %p2909_p6 }
  0xd1   :  { %p2912_p9 = pnand %p2911_p8, %p2905_p5 }
  0xd3   :  { %2915 = shalt.err (!%p2912_p9)
}
  0xd4   :  { %102 = dma.hbm_to_vmem [thread:$0]  %s3942_s5, 256, %s97_s22, [#allocation10], %s3095_s4, %s3095_s4, %s3096_s2  }
  0xd5   :  { %s2916_s3 = scalar_lea.hbm %s3905_s8, 256 }
  0xd6   :  { %p2917_p10 = scmp.ne.s32.totalorder %s3905_s8, %s2916_s3  ;;  %p2920_p11 = scmp.lt.u32.totalorder %s2916_s3, %s3905_s8 }
  0xd8   :  { %p2922_p12 = pnand %p2920_p11, %p2917_p10 }
  0xda   :  { %2925 = shalt.err (!%p2922_p12)
}
  0xdb   :  { %s2926_s29 = scalar_lea.vmem %s121_s0, 256  ;;  %p2931_p0 = scmp.lt.s32.totalorder %s121_s0, %s121_s0 }
  0xdc   :  { %p2927_p13 = scmp.ne.s32.totalorder %s121_s0, %s2926_s29  ;;  %p2932_p1 = scmp.lt.s32.totalorder %s2926_s29, %s2926_s29 }
  0xde   :  { %p2933_p2 = por %p2932_p1, %p2931_p0 }
  0xe0   :  { %p2934_p3 = pnand %p2933_p2, %p2927_p13 }
  0xe2   :  { %2937 = shalt.err (!%p2934_p3)
}
  0xe3   :  { %126 = dma.hbm_to_vmem [thread:$0]  %s3905_s8, 256, %s121_s0, [#allocation13], %s3095_s4, %s3095_s4, %s3096_s2  }
  0xe4   :  { %s3105_s28 = smov [#allocation17]   ;;  %s3106_s7 = smov [#allocation20]  }
  0xe5   :  { %s143_s27 = sshll.u32 %s3105_s28, 4  ;;  %s166_s21 = sshll.u32 %s3106_s7, 4  ;;  %s144_s27 = int_to_ptr.vmem [resolvable:$true] %s143_s27  ;;  %s167_s21 = int_to_ptr.vmem [resolvable:$true] %s166_s21 }
  0xe6   :  { %s2938_s14 = scalar_lea.hbm %s3907_s10, 16 }
  0xe7   :  { %p2939_p4 = scmp.ne.s32.totalorder %s3907_s10, %s2938_s14  ;;  %p2942_p5 = scmp.lt.u32.totalorder %s2938_s14, %s3907_s10 }
  0xe9   :  { %p2944_p6 = pnand %p2942_p5, %p2939_p4 }
  0xeb   :  { %2947 = shalt.err (!%p2944_p6)
}
  0xec   :  { %s2948_s8 = scalar_lea.vmem %s144_s27, 16  ;;  %s2952_s0 = scalar_lea.vmem %s144_s27, 32 }
  0xed   :  { %p2949_p7 = scmp.ne.s32.totalorder %s144_s27, %s2948_s8  ;;  %p2953_p8 = scmp.lt.s32.totalorder %s144_s27, %s144_s27 }
  0xee   :  { %p2954_p9 = scmp.lt.s32.totalorder %s2952_s0, %s2948_s8 }
  0xf0   :  { %p2955_p10 = por %p2954_p9, %p2953_p8 }
  0xf2   :  { %p2956_p11 = pnand %p2955_p10, %p2949_p7 }
  0xf4   :  { %2959 = shalt.err (!%p2956_p11)
}
  0xf5   :  { %146 = dma.hbm_to_vmem [thread:$0]  %s3907_s10, 16, %s144_s27, [#allocation16]  }
  0xf6   :  { %s2960_s29 = scalar_lea.hbm %s3910_s13, 256 }
  0xf7   :  { %p2961_p12 = scmp.ne.s32.totalorder %s3910_s13, %s2960_s29  ;;  %p2964_p13 = scmp.lt.u32.totalorder %s2960_s29, %s3910_s13 }
  0xf9   :  { %p2966_p0 = pnand %p2964_p13, %p2961_p12 }
  0xfb   :  { %2969 = shalt.err (!%p2966_p0)
}
  0xfc   :  { %s2970_s30 = scalar_lea.vmem %s167_s21, 256  ;;  %p2975_p2 = scmp.lt.s32.totalorder %s167_s21, %s167_s21 }
  0xfd   :  { %p2971_p1 = scmp.ne.s32.totalorder %s167_s21, %s2970_s30  ;;  %p2976_p3 = scmp.lt.s32.totalorder %s2970_s30, %s2970_s30 }
  0xff   :  { %p2977_p4 = por %p2976_p3, %p2975_p2 }
 0x101   :  { %p2978_p5 = pnand %p2977_p4, %p2971_p1 }
 0x103   :  { %2981 = shalt.err (!%p2978_p5)
}
 0x104   :  { %172 = dma.hbm_to_vmem [thread:$0]  %s3910_s13, 256, %s167_s21, [#allocation19], %s3095_s4, %s3095_s4, %s3096_s2  }
 0x105   :  { %s3107_s23 = smov [#allocation23]   ;;  %s3108_s12 = smov [#allocation26]  }
 0x106   :  { %s192_s14 = sshll.u32 %s3107_s23, 4  ;;  %s216_s20 = sshll.u32 %s3108_s12, 4  ;;  %s193_s14 = int_to_ptr.vmem [resolvable:$true] %s192_s14  ;;  %s217_s20 = int_to_ptr.vmem [resolvable:$true] %s216_s20 }
 0x107   :  { %s2982_s8 = scalar_lea.hbm %s3913_s16, 256 }
 0x108   :  { %p2983_p6 = scmp.ne.s32.totalorder %s3913_s16, %s2982_s8  ;;  %p2986_p7 = scmp.lt.u32.totalorder %s2982_s8, %s3913_s16 }
 0x10a   :  { %p2988_p8 = pnand %p2986_p7, %p2983_p6 }
 0x10c   :  { %2991 = shalt.err (!%p2988_p8)
}
 0x10d   :  { %s2992_s13 = scalar_lea.vmem %s193_s14, 256  ;;  %p2997_p10 = scmp.lt.s32.totalorder %s193_s14, %s193_s14 }
 0x10e   :  { %p2993_p9 = scmp.ne.s32.totalorder %s193_s14, %s2992_s13  ;;  %p2998_p11 = scmp.lt.s32.totalorder %s2992_s13, %s2992_s13 }
 0x110   :  { %p2999_p12 = por %p2998_p11, %p2997_p10 }
 0x112   :  { %p3000_p13 = pnand %p2999_p12, %p2993_p9 }
 0x114   :  { %3003 = shalt.err (!%p3000_p13)
}
 0x115   :  { %198 = dma.hbm_to_vmem [thread:$0]  %s3913_s16, 256, %s193_s14, [#allocation22], %s3095_s4, %s3095_s4, %s3096_s2  }
 0x116   :  { %s3004_s5 = scalar_lea.hbm %s3915_s18, 256 }
 0x117   :  { %p3005_p0 = scmp.ne.s32.totalorder %s3915_s18, %s3004_s5  ;;  %p3008_p1 = scmp.lt.u32.totalorder %s3004_s5, %s3915_s18 }
 0x119   :  { %p3010_p2 = pnand %p3008_p1, %p3005_p0 }
 0x11b   :  { %3013 = shalt.err (!%p3010_p2)
}
 0x11c   :  { %s3014_s27 = scalar_lea.vmem %s217_s20, 256  ;;  %p3019_p4 = scmp.lt.s32.totalorder %s217_s20, %s217_s20 }
 0x11d   :  { %p3015_p3 = scmp.ne.s32.totalorder %s217_s20, %s3014_s27  ;;  %p3020_p5 = scmp.lt.s32.totalorder %s3014_s27, %s3014_s27 }
 0x11f   :  { %p3021_p6 = por %p3020_p5, %p3019_p4 }
 0x121   :  { %p3022_p7 = pnand %p3021_p6, %p3015_p3 }
 0x123   :  { %3025 = shalt.err (!%p3022_p7)
}
 0x124   :  { %222 = dma.hbm_to_vmem [thread:$0]  %s3915_s18, 256, %s217_s20, [#allocation25], %s3095_s4, %s3095_s4, %s3096_s2  }
 0x125   :  { %3070 = dma.done.wait [#allocation4], 256  }
 0x126   :  { %3071 = vsyncadd [#allocation4], 4294967040 }
 0x127   :  { %3072 = dma.done.wait [#allocation7], 512  }
 0x128   :  { %3073 = vsyncadd [#allocation7], 4294966784 }
 0x129   :  { %3074 = dma.done.wait [#allocation10], 512  }
 0x12a   :  { %3075 = vsyncadd [#allocation10], 4294966784 }
 0x12b   :  { %3076 = dma.done.wait [#allocation13], 512  }
 0x12c   :  { %3077 = vsyncadd [#allocation13], 4294966784 }
 0x12d   :  { %3078 = dma.done.wait [#allocation16], 32  }
 0x12e   :  { %3079 = vsyncadd [#allocation16], 4294967264 }
 0x12f   :  { %3080 = dma.done.wait [#allocation19], 640  }
 0x130   :  { %3081 = vsyncadd [#allocation19], 4294966656 }
 0x131   :  { %3082 = dma.done.wait [#allocation22], 512  }
 0x132   :  { %3083 = vsyncadd [#allocation22], 4294966784 }
 0x133   :  { %3084 = dma.done.wait [#allocation25], 512  }
 0x134   :  { %3085 = vsyncadd [#allocation25], 4294966784  ;;  %v3109_v0 = vmov 0.0   ;;  %vm3110_vm0 = vmmov 0   ;;  %v2590_v1 = vld [vmem:[#allocation8] sm:$0xff]   ;;  %v2591_v2 = vld [vmem:[#allocation8 + $0x8] sm:$0xff]  }
 0x135   :  { %2343 = vmatprep.subr.bf16.mxu0 %v3109_v0  ;;  %2347 = vmatprep.mubr.msk.bf16.mxu0 %vm3110_vm0, %v3109_v0  ;;  %v274_v3 = vld [vmem:[#allocation6] sm:$0xff]  ;;  %v275_v4 = vld [vmem:[#allocation6 + $0x8] sm:$0xff]  ;;  %vm298_vm1 = vcmask 261120   ;;  %v3463_v11 = vld [vmem:[#allocation3] sm:$0xff]   ;;  %s3111_s18 = smov 96   ;;  %vm349_vm2 = vcmask 130048  }
 0x136   :  { %2351 = vmatprep.subr.bf16.mxu1 %v3109_v0  ;;  %2353 = vmatprep.mubr.msk.bf16.mxu1 %vm3110_vm0, %v3109_v0  ;;  %v3456_v5 = vpack.c.bf16 %v275_v4, %v274_v3  ;;  %v2594_v12 = vld [vmem:[#allocation9] sm:$0xff]   ;;  %v2595_v13 = vld [vmem:[#allocation9 + $0x8] sm:$0xff]   ;;  %v3473_v15 = vld [vmem:[#allocation3 + $0x8] sm:$0xff]   ;;  %s3943_s12 = sld [smem:[#allocation40_spill]]  ;;  %s3944_s3 = sld [smem:[#allocation45_spill]]  ;;  %vm1199_vm11 = vcmask 195584  }
 0x137   :  { %2344 = vmatpush3.bf16.msra.mxu0 %v2590_v1  ;;  %v2598_v55 = vld [vmem:[#allocation12] sm:$0xff]   ;;  %v2599_v58 = vld [vmem:[#allocation12 + $0x8] sm:$0xff]   ;;  %vm1206_vm12 = vcmask 1043456   ;;  %s3945_s23 = sld [smem:[#allocation47_spill]] }
 0x138   :  { %2345 = vmatprep.subr.bf16.mxu0 %v3109_v0 }
 0x13b   :  { %2346 = vmatpush3.bf16.msra.mxu0 %v2591_v2 }
 0x13c   :  { %2363 = vmatprep.subr.bf16.mxu0 %v3109_v0  ;;  %v3483_v16 = vstv %s3943_s12  ;;  %v2596_v26 = vld [vmem:[%s3944_s3] sm:$0xff]   ;;  %v2597_v31 = vld [vmem:[%s3944_s3 + $0x8] sm:$0xff]   ;;  %s3113_s12 = smov [#allocation27]  }
 0x13d   :  { %s2155_s20 = sshll.u32 %s3113_s12, 4  ;;  %s2156_s20 = int_to_ptr.vmem [resolvable:$true] %s2155_s20 }
 0x13e   :  { %2348 = vmatmul.mubr.msk.bf16.vlgmr.msra.gmra.mrb[0].mxu0 %vm298_vm1, %v3456_v5  ;;  %s3026_s24 = scalar_lea.vmem %s2156_s20, 256  ;;  %p3031_p9 = scmp.lt.s32.totalorder %s2156_s20, %s2156_s20 }
 0x13f   :  { %2367 = vmatprep.mubr.msk.bf16.mxu0 %vm3110_vm0, %v3109_v0  ;;  %2364 = vmatpush3.bf16.msra.mxu0 %v2594_v12  ;;  %p3027_p8 = scmp.ne.s32.totalorder %s2156_s20, %s3026_s24  ;;  %p3032_p10 = scmp.lt.s32.totalorder %s3026_s24, %s3026_s24 }
 0x140   :  { %2365 = vmatprep.subr.bf16.mxu0 %v3109_v0 }
 0x141   :  { %p3033_p11 = por %p3032_p10, %p3031_p9 }
 0x143   :  { %2366 = vmatpush3.bf16.msra.mxu0 %v2595_v13  ;;  %p3034_p12 = pnand %p3033_p11, %p3027_p8 }
 0x144   :  { %2377 = vmatprep.subr.bf16.mxu0 %v3109_v0 }
 0x211   :  { %v336_v6 = vpop.f32.mrb[0].mxu0 }
 0x212   :  { %v2349_v7 = vpop.f32.mrb[1].mxu0 }
 0x213   :  { %v339_v8 = vpop.f32.mrb[2].mxu0 }
 0x214   :  { %v343_v9 = vpack.c.bf16 %v339_v8, %v336_v6  ;;  %v2350_v10 = vpop.f32.mrb[3].mxu0 }
 0x216   :  { %421 = vrot.lane.b32.xlu0 %v343_v9, %s3111_s18  ;;  %2352 = vmatpush3.bf16.msra.mxu1 %v343_v9 }
 0x217   :  { %2357 = vmatprep.subr.bf16.mxu1 %v3109_v0 }
 0x219   :  { %2354 = vmatmul.mubr.msk.bf16.vlgmr.msra.gmra.mrb[0].mxu1 %vm349_vm2, %v3463_v11 }
 0x21a   :  { %2359 = vmatprep.mubr.msk.bf16.mxu1 %vm3110_vm0, %v3109_v0 }
 0x288   :  { %v422_v14 = vpop.permute.xlu0 %421 }
 0x289   :  { %2358 = vmatpush3.bf16.msra.mxu1 %v422_v14 }
 0x28a   :  { %2371 = vmatprep.subr.bf16.mxu1 %v3109_v0 }
 0x28c   :  { %2360 = vmatmul.mubr.msk.bf16.vlgmr.msra.gmra.mrb[4].mxu1 %vm349_vm2, %v3473_v15 }
 0x28d   :  { %2373 = vmatprep.mubr.msk.bf16.mxu1 %vm3110_vm0, %v3109_v0 }
 0x2ec   :  { %v387_v17 = vpop.f32.mrb[0].mxu1 }
 0x2ed   :  { %vm394_vm3 = vcmp.ge.f32.partialorder %v387_v17, 0.0  ;;  %v397_v18 = vmul.f32 %v3483_v16, %v387_v17  ;;  %v2355_v19 = vpop.f32.mrb[1].mxu1 }
 0x2ee   :  { %v390_v20 = vpop.f32.mrb[2].mxu1  ;;  %v2602_v19 = vld [vmem:[#allocation11 + $0x8] sm:$0xff]  }
 0x2ef   :  { %v3486_v21 = vsel %vm394_vm3, %v387_v17, %v397_v18  ;;  %vm395_vm4 = vcmp.ge.f32.partialorder %v390_v20, 0.0  ;;  %v398_v22 = vmul.f32 %v3483_v16, %v390_v20  ;;  %v2356_v23 = vpop.f32.mrb[3].mxu1  ;;  %v2600_v17 = vld [vmem:[#allocation11] sm:$0xff]  }
 0x2f0   :  { %v401_v24 = vmul.f32 %v3486_v21, %v3486_v21  ;;  %v3556_v18 = vld [vmem:[#allocation14] sm:$0xff]  }
 0x2f1   :  { %v400_v25 = vsel %vm395_vm4, %v390_v20, %v398_v22  ;;  %v3561_v20 = vld [vmem:[#allocation14 + $0x8] sm:$0xff]  }
 0x2f2   :  { %v492_v27 = vpack.c.bf16 %v400_v25, %v3486_v21  ;;  %v403_v28 = vsel %vm298_vm1, %v401_v24, 0.0  ;;  %v402_v29 = vmul.f32 %v400_v25, %v400_v25 }
 0x2f3   :  { %404 = vadd.xlane.f32.xlu0 %v403_v28 }
 0x2f4   :  { %2368 = vmatmul.mubr.msk.bf16.vlgmr.msra.gmra.mrb[4].mxu0 %vm298_vm1, %v492_v27  ;;  %v406_v30 = vsel %vm298_vm1, %v402_v29, 0.0 }
 0x2f5   :  { %407 = vadd.xlane.f32.xlu1 %v406_v30  ;;  %2378 = vmatpush3.bf16.msra.mxu0 %v2596_v26 }
 0x2f6   :  { %2379 = vmatprep.subr.bf16.mxu0 %v3109_v0  ;;  %2381 = vmatprep.mubr.msk.bf16.mxu0 %vm3110_vm0, %v3109_v0 }
 0x2f9   :  { %2380 = vmatpush3.bf16.msra.mxu0 %v2597_v31 }
 0x2fa   :  { %2391 = vmatprep.subr.bf16.mxu0 %v3109_v0 }
 0x35f   :  { %v461_v32 = vpop.f32.mrb[4].mxu1 }
 0x360   :  { %vm468_vm5 = vcmp.ge.f32.partialorder %v461_v32, 0.0  ;;  %v470_v33 = vmul.f32 %v461_v32, %v3483_v16  ;;  %v2361_v34 = vpop.f32.mrb[5].mxu1 }
 0x361   :  { %v464_v35 = vpop.f32.mrb[6].mxu1 }
 0x362   :  { %v3506_v36 = vsel %vm468_vm5, %v461_v32, %v470_v33  ;;  %vm469_vm6 = vcmp.ge.f32.partialorder %v464_v35, 0.0  ;;  %v471_v37 = vmul.f32 %v464_v35, %v3483_v16  ;;  %v2362_v38 = vpop.f32.mrb[7].mxu1 }
 0x363   :  { %v474_v12 = vmul.f32 %v3506_v36, %v3506_v36 }
 0x364   :  { %v3509_v39 = vsel %vm469_vm6, %v464_v35, %v471_v37 }
 0x365   :  { %v615_v40 = vpack.c.bf16 %v3509_v39, %v3506_v36  ;;  %v476_v13 = vsel %vm298_vm1, %v474_v12, 0.0  ;;  %v475_v14 = vmul.f32 %v3509_v39, %v3509_v39 }
 0x367   :  { %2382 = vmatmul.mubr.msk.bf16.vlgmr.msra.gmra.mrb[8].mxu0 %vm298_vm1, %v615_v40 }
 0x368   :  { %2395 = vmatprep.mubr.msk.bf16.mxu0 %vm3110_vm0, %v3109_v0  ;;  %2392 = vmatpush3.bf16.msra.mxu0 %v2600_v17 }
 0x369   :  { %2393 = vmatprep.subr.bf16.mxu0 %v3109_v0 }
 0x36c   :  { %2394 = vmatpush3.bf16.msra.mxu0 %v2602_v19 }
 0x36d   :  { %2415 = vmatprep.subr.bf16.mxu0 %v3109_v0 }
 0x36f   :  { %2396 = vmatmul.mubr.msk.bf16.vlgmr.msra.gmra.mrb[12].mxu0 %vm298_vm1, %v3456_v5 }
 0x370   :  { %2416 = vmatpush3.bf16.msra.mxu0 %v2598_v55  ;;  %2419 = vmatprep.mubr.msk.bf16.mxu0 %vm3110_vm0, %v3109_v0 }
 0x371   :  { %2417 = vmatprep.subr.bf16.mxu0 %v3109_v0 }
 0x374   :  { %2418 = vmatpush3.bf16.msra.mxu0 %v2599_v58 }
 0x375   :  { %2423 = vmatprep.subr.bf16.mxu0 %v3109_v0 }
 0x380   :  { %v405_v47 = vpop.xlane.xlu0 %404 }
 0x381   :  { %v409_v49 = vmax.f32 %v405_v47, 1e-24 }
 0x382   :  { %v408_v46 = vpop.xlane.xlu1 %407 }
 0x383   :  { %v410_v48 = vmax.f32 %v408_v46, 1e-24 }
 0x385   :  { %2620 = vrsqrt.f32 %v410_v48 }
 0x386   :  { %2622 = vrsqrt.f32 %v409_v49 }
 0x38f   :  { %v2621_v56 = vpop.eup %2620 }
 0x390   :  { %v2623_v57 = vpop.eup %2622  ;;  %v3526_v59 = vmul.f32 %v2621_v56, %v400_v25 }
 0x391   :  { %v3530_v60 = vmul.f32 %v2623_v57, %v3486_v21  ;;  %v2604_v21 = vld [vmem:[#allocation20] sm:$0xff]  }
 0x393   :  { %v799_v61 = vpack.c.bf16 %v3526_v59, %v3530_v60 }
 0x3c7   :  { %v542_v41 = vpop.f32.mrb[4].mxu0 }
 0x3c8   :  { %v2369_v42 = vpop.f32.mrb[5].mxu0 }
 0x3c9   :  { %v545_v43 = vpop.f32.mrb[6].mxu0 }
 0x3ca   :  { %v549_v44 = vpack.c.bf16 %v545_v43, %v542_v41  ;;  %v2370_v45 = vpop.f32.mrb[7].mxu0 }
 0x3cb   :  { %v1108_v45 = vld [vmem:[#allocation18 + $0x8] sm:$0xff] }
 0x3cc   :  { %2372 = vmatpush3.bf16.msra.mxu1 %v549_v44  ;;  %v1107_v44 = vld [vmem:[#allocation18] sm:$0xff] }
 0x3cd   :  { %2385 = vmatprep.subr.bf16.mxu1 %v3109_v0  ;;  %v3581_v49 = vpack.c.bf16 %v1108_v45, %v1107_v44 }
 0x3cf   :  { %2374 = vmatmul.mubr.msk.bf16.vlgmr.msra.gmra.mrb[8].mxu1 %vm349_vm2, %v3463_v11 }
 0x3d0   :  { %2387 = vmatprep.mubr.msk.bf16.mxu1 %vm3110_vm0, %v3109_v0 }
 0x43a   :  { %v665_v50 = vpop.f32.mrb[8].mxu0 }
 0x43b   :  { %v2383_v51 = vpop.f32.mrb[9].mxu0 }
 0x43c   :  { %v668_v52 = vpop.f32.mrb[10].mxu0  ;;  %v2605_v51 = vld [vmem:[#allocation20 + $0x8] sm:$0xff]  }
 0x43d   :  { %v672_v53 = vpack.c.bf16 %v668_v52, %v665_v50  ;;  %v2384_v54 = vpop.f32.mrb[11].mxu0 }
 0x43f   :  { %2386 = vmatpush3.bf16.msra.mxu1 %v672_v53  ;;  %v3588_v53 = vld [vmem:[#allocation18 + $0x10] sm:$0xff] }
 0x440   :  { %2399 = vmatprep.subr.bf16.mxu1 %v3109_v0  ;;  %v3598_v57 = vpack.c.bf16 %v3588_v53, %v3588_v53 }
 0x442   :  { %2388 = vmatmul.mubr.msk.bf16.vlgmr.msra.gmra.mrb[12].mxu1 %vm349_vm2, %v3473_v15  ;;  %v479_v15 = vsel %vm298_vm1, %v475_v14, 0.0 }
 0x443   :  { %2400 = vmatpush3.bf16.msra.mxu1 %v2598_v55  ;;  %2403 = vmatprep.mubr.msk.bf16.mxu1 %vm3110_vm0, %v3109_v0 }
 0x444   :  { %2401 = vmatprep.subr.bf16.mxu1 %v3109_v0 }
 0x447   :  { %2402 = vmatpush3.bf16.msra.mxu1 %v2599_v58 }
 0x448   :  { %2407 = vmatprep.subr.bf16.mxu1 %v3109_v0 }
 0x44a   :  { %2404 = vmatmul.mubr.msk.bf16.vlgmr.msra.gmra.mrb[16].mxu1 %vm298_vm1, %v799_v61 }
 0x44b   :  { %2411 = vmatprep.mubr.msk.bf16.mxu1 %vm3110_vm0, %v3109_v0  ;;  %2408 = vmatpush3.bf16.msra.mxu1 %v3556_v18 }
 0x44c   :  { %2409 = vmatprep.subr.bf16.mxu1 %v3109_v0 }
 0x44f   :  { %2410 = vmatpush3.bf16.msra.mxu1 %v3561_v20 }
 0x450   :  { %2431 = vmatprep.subr.bf16.mxu1 %v2604_v21 }
 0x4a2   :  { %v584_v62 = vpop.f32.mrb[8].mxu1 }
 0x4a3   :  { %vm591_vm7 = vcmp.ge.f32.partialorder %v584_v62, 0.0  ;;  %v593_v63 = vmul.f32 %v584_v62, %v3483_v16  ;;  %v2375_v1 = vpop.f32.mrb[9].mxu1 }
 0x4a4   :  { %v587_v2 = vpop.f32.mrb[10].mxu1 }
 0x4a5   :  { %vm592_vm8 = vcmp.ge.f32.partialorder %v587_v2, 0.0  ;;  %v594_v3 = vmul.f32 %v587_v2, %v3483_v16  ;;  %v2376_v4 = vpop.f32.mrb[11].mxu1  ;;  %v3540_v6 = vsel %vm591_vm7, %v584_v62, %v593_v63 }
 0x4a6   :  { %v597_v7 = vmul.f32 %v3540_v6, %v3540_v6 }
 0x4a7   :  { %v3544_v8 = vsel %vm592_vm8, %v587_v2, %v594_v3 }
 0x4a8   :  { %v599_v9 = vsel %vm298_vm1, %v597_v7, 0.0  ;;  %v598_v10 = vmul.f32 %v3544_v8, %v3544_v8 }
 0x4a9   :  { %600 = vadd.xlane.f32.xlu1 %v599_v9 }
 0x4aa   :  { %v602_v11 = vsel %vm298_vm1, %v598_v10, 0.0  ;;  %v2205_v10 = vld [vmem:[#allocation15] ss:$0 sm:$0xff] }
 0x4ad   :  { %603 = vadd.xlane.f32.xlu1 %v602_v11 }
 0x4b1   :  { %477 = vadd.xlane.f32.xlu1 %v476_v13 }
 0x4b5   :  { %480 = vadd.xlane.f32.xlu1 %v479_v15 }
 0x515   :  { %v707_v22 = vpop.f32.mrb[12].mxu1 }
 0x516   :  { %vm714_vm9 = vcmp.ge.f32.partialorder %v707_v22, 0.0  ;;  %v716_v23 = vmul.f32 %v707_v22, %v3483_v16  ;;  %v2389_v24 = vpop.f32.mrb[13].mxu1 }
 0x517   :  { %v710_v25 = vpop.f32.mrb[14].mxu1 }
 0x518   :  { %vm715_vm10 = vcmp.ge.f32.partialorder %v710_v25, 0.0  ;;  %v717_v5 = vmul.f32 %v710_v25, %v3483_v16  ;;  %v718_v26 = vsel %vm714_vm9, %v707_v22, %v716_v23  ;;  %v2390_v27 = vpop.f32.mrb[15].mxu1 }
 0x519   :  { %v720_v28 = vmul.f32 %v718_v26, %v718_v26  ;;  %v2215_v27 = vld [vmem:[#allocation17] ss:$0 sm:$0xff] }
 0x51a   :  { %v719_v29 = vsel %vm715_vm10, %v710_v25, %v717_v5  ;;  %vm1087_vm10 = vcmask 523520  }
 0x51b   :  { %v722_v30 = vsel %vm298_vm1, %v720_v28, 0.0  ;;  %v721_v31 = vmul.f32 %v719_v29, %v719_v29 }
 0x51c   :  { %723 = vadd.xlane.f32.xlu1 %v722_v30 }
 0x51d   :  { %v725_v32 = vsel %vm298_vm1, %v721_v31, 0.0 }
 0x520   :  { %726 = vadd.xlane.f32.xlu1 %v725_v32  ;;  %v3638_v32 = vld [vmem:[%s3908_s11 + $0x8] ss:$0 sps:$4 sm:$0xff]  }
 0x536   :  { %v601_v33 = vpop.xlane.xlu1 %600 }
 0x537   :  { %v605_v34 = vmax.f32 %v601_v33, 1e-24 }
 0x539   :  { %2624 = vrsqrt.f32 %v605_v34  ;;  %v2610_v34 = vld [vmem:[#allocation21] sm:$0xff]  }
 0x53a   :  { %v604_v35 = vpop.xlane.xlu1 %603 }
 0x53b   :  { %v606_v37 = vmax.f32 %v604_v35, 1e-24  ;;  %v2611_v35 = vld [vmem:[#allocation21 + $0x8] sm:$0xff]  }
 0x53d   :  { %2626 = vrsqrt.f32 %v606_v37 }
 0x53e   :  { %v478_v38 = vpop.xlane.xlu1 %477 }
 0x53f   :  { %v482_v40 = vmax.f32 %v478_v38, 1e-24 }
 0x541   :  { %2628 = vrsqrt.f32 %v482_v40 }
 0x542   :  { %v481_v41 = vpop.xlane.xlu1 %480 }
 0x543   :  { %v483_v42 = vmax.f32 %v481_v41, 1e-24  ;;  %v2625_v43 = vpop.eup %2624 }
 0x544   :  { %v3576_v47 = vmul.f32 %v2625_v43, %v3540_v6 }
 0x545   :  { %2630 = vrsqrt.f32 %v483_v42 }
 0x547   :  { %v2627_v46 = vpop.eup %2626 }
 0x548   :  { %v3579_v48 = vmul.f32 %v2627_v46, %v3544_v8 }
 0x54a   :  { %v862_v50 = vpack.c.bf16 %v3579_v48, %v3576_v47 }
 0x54b   :  { %v2629_v52 = vpop.eup %2628 }
 0x54c   :  { %2412 = vmatmul.mubr.msk.bf16.vlgmr.msra.gmra.mrb[16].mxu1 %vm298_vm1, %v862_v50  ;;  %v3591_v55 = vmul.f32 %v2629_v52, %v3506_v36  ;;  %v792_v36 = vpop.f32.mrb[12].mxu0 }
 0x54d   :  { %2432 = vmatpush3.bf16.msra.mxu1 %v2604_v21  ;;  %2435 = vmatprep.mubr.msk.bf16.mxu1 %vm298_vm1, %v3581_v49  ;;  %v793_v11 = vadd.f32 %v2205_v10, %v792_v36 }
 0x54e   :  { %2433 = vmatprep.subr.bf16.mxu1 %v2605_v51 }
 0x54f   :  { %v2631_v54 = vpop.eup %2630 }
 0x550   :  { %v3594_v56 = vmul.f32 %v2631_v54, %v3509_v39  ;;  %v2397_v39 = vpop.f32.mrb[13].mxu0 }
 0x551   :  { %2434 = vmatpush3.bf16.msra.mxu1 %v2605_v51  ;;  %v795_v61 = vpop.f32.mrb[14].mxu0  ;;  %v2612_v39 = vld [vmem:[%s3912_s15] sm:$0xff]  }
 0x552   :  { %v947_v58 = vpack.c.bf16 %v3594_v56, %v3591_v55  ;;  %v2398_v62 = vpop.f32.mrb[15].mxu0  ;;  %v796_v12 = vadd.f32 %v2205_v10, %v795_v61 }
 0x554   :  { %2420 = vmatmul.mubr.msk.bf16.vlgmr.msra.gmra.mrb[16].mxu0 %vm298_vm1, %v947_v58  ;;  %2436 = vmatmul.mubr.msk.bf16.vlgmr.msra.gmra.mrb[20].mxu1 %vm298_vm1, %v3598_v57  ;;  %v3649_v58 = vld [vmem:[%s3908_s11 + $0x14] ss:$0 sps:$4 sm:$0xff]  }
 0x555   :  { %2424 = vmatpush3.bf16.msra.mxu0 %v3556_v18  ;;  %2427 = vmatprep.mubr.msk.bf16.mxu0 %vm3110_vm0, %v3109_v0 }
 0x556   :  { %2425 = vmatprep.subr.bf16.mxu0 %v3109_v0  ;;  %v3617_v0 = vld [vmem:[%s3908_s11] sm:$0xff]  }
 0x559   :  { %2426 = vmatpush3.bf16.msra.mxu0 %v3561_v20  ;;  %v3627_v20 = vld [vmem:[%s3908_s11 + $0xc] sm:$0xff]  }
 0x55a   :  { %2451 = vmatprep.mubr.msk.bf16.mxu1 %vm1199_vm11, %v3627_v20 }
 0x5a9   :  { %v724_v63 = vpop.xlane.xlu1 %723 }
 0x5aa   :  { %v728_v1 = vmax.f32 %v724_v63, 1e-24 }
 0x5ac   :  { %2632 = vrsqrt.f32 %v728_v1 }
 0x5ad   :  { %v727_v2 = vpop.xlane.xlu1 %726 }
 0x5ae   :  { %v729_v3 = vmax.f32 %v727_v2, 1e-24 }
 0x5b0   :  { %2634 = vrsqrt.f32 %v729_v3 }
 0x5b6   :  { %v2633_v4 = vpop.eup %2632 }
 0x5b7   :  { %v3610_v6 = vmul.f32 %v2633_v4, %v718_v26 }
 0x5ba   :  { %v2635_v7 = vpop.eup %2634 }
 0x5bb   :  { %v3612_v8 = vmul.f32 %v2635_v7, %v719_v29 }
 0x5bd   :  { %v994_v9 = vpack.c.bf16 %v3612_v8, %v3610_v6 }
 0x5bf   :  { %2428 = vmatmul.mubr.msk.bf16.vlgmr.msra.gmra.mrb[16].mxu0 %vm298_vm1, %v994_v9 }
 0x5c0   :  { %2443 = vmatprep.mubr.msk.bf16.mxu0 %vm1199_vm11, %v3617_v0 }
 0x61f   :  { %v916_v13 = vpop.f32.mrb[16].mxu1 }
 0x620   :  { %v2527_v14 = vadd.f32 %v916_v13, %v793_v11  ;;  %v2413_v15 = vpop.f32.mrb[17].mxu1 }
 0x621   :  { %v919_v17 = vpop.f32.mrb[18].mxu1 }
 0x622   :  { %2636 = vtanh.f32 %v2527_v14  ;;  %v2528_v18 = vadd.f32 %v919_v17, %v796_v12  ;;  %v2414_v19 = vpop.f32.mrb[19].mxu1  ;;  %v2613_v17 = vld [vmem:[%s3912_s15 + $0x8] sm:$0xff]  }
 0x624   :  { %2638 = vtanh.f32 %v2528_v18 }
 0x627   :  { %v2437_v21 = vpop.f32.mrb[20].mxu1 }
 0x628   :  { %v1190_v22 = vpack.c.bf16 %v2437_v21, %v2437_v21  ;;  %v1175_v23 = vpop.f32.mrb[21].mxu1 }
 0x629   :  { %v2438_v24 = vpop.f32.mrb[22].mxu1 }
 0x62a   :  { %v1178_v25 = vpop.f32.mrb[23].mxu1  ;;  %1300 = vrot.lane.b32.xlu0 %v1190_v22, %s3111_s18  ;;  %v1208_v31 = vsel %vm1206_vm12, %v1190_v22, 0 }
 0x62b   :  { %v1189_v5 = vpack.c.bf16 %v1178_v25, %v1175_v23 }
 0x62c   :  { %v2637_v26 = vpop.eup %2636 }
 0x62d   :  { %1298 = vrot.lane.b32.xlu1 %v1189_v5, %s3111_s18  ;;  %2439 = vmatprep.subr.bf16.mxu0 %v1189_v5  ;;  %v933_v29 = vmul.f32 %v2637_v26, %v2215_v27  ;;  %s3112_s18 = smov 32  }
 0x62e   :  { %v2639_v28 = vpop.eup %2638  ;;  %2440 = vmatpush3.bf16.msra.mxu0 %v1189_v5 }
 0x62f   :  { %2553 = vmatprep.subr.msk.bf16.mxu0 %vm1206_vm12, %v1190_v22  ;;  %v934_v30 = vmul.f32 %v2639_v28, %v2215_v27 }
 0x631   :  { %v3640_v33 = vadd.f32 %v934_v30, %v933_v29 }
 0x632   :  { %2442 = vmatpush3.bf16.msra.mxu0 %v1208_v31 }
 0x633   :  { %2455 = vmatprep.subr.bf16.mxu0 %v2610_v34 }
 0x635   :  { %2444 = vmatmul.mubr.msk.bf16.vlgmr.msra.gmra.mrb[20].mxu0 %vm1199_vm11, %v3638_v32 }
 0x636   :  { %2456 = vmatpush3.bf16.msra.mxu0 %v2610_v34 }
 0x637   :  { %2457 = vmatprep.subr.bf16.mxu0 %v2611_v35 }
 0x63a   :  { %2458 = vmatpush3.bf16.msra.mxu0 %v2611_v35 }
 0x63b   :  { %2471 = vmatprep.subr.bf16.mxu0 %v2612_v39 }
 0x692   :  { %v1032_v37 = vpop.f32.mrb[16].mxu0 }
 0x693   :  { %v2529_v38 = vadd.f32 %v1032_v37, %v793_v11  ;;  %v2429_v40 = vpop.f32.mrb[17].mxu0 }
 0x694   :  { %v1035_v41 = vpop.f32.mrb[18].mxu0 }
 0x695   :  { %2640 = vtanh.f32 %v2529_v38  ;;  %v2530_v42 = vadd.f32 %v1035_v41, %v796_v12  ;;  %v2430_v43 = vpop.f32.mrb[19].mxu0 }
 0x696   :  { %v2615_v43 = vld [vmem:[#allocation23 + $0x8] sm:$0xff]  }
 0x697   :  { %2642 = vtanh.f32 %v2530_v42  ;;  %v2614_v42 = vld [vmem:[#allocation23] sm:$0xff]  }
 0x69c   :  { %v1301_v50 = vpop.permute.xlu0 %1300 }
 0x69d   :  { %v1310_v54 = vsel %vm1206_vm12, %v1301_v50, 0 }
 0x69f   :  { %v2641_v44 = vpop.eup %2640  ;;  %v1299_v45 = vpop.permute.xlu1 %1298 }
 0x6a0   :  { %2447 = vmatprep.subr.bf16.mxu1 %v1299_v45  ;;  %v1043_v51 = vmul.f32 %v2641_v44, %v2215_v27  ;;  %v3697_v44 = vld [vmem:[#allocation24] sm:$0xff]  }
 0x6a1   :  { %v2643_v46 = vpop.eup %2642  ;;  %2448 = vmatpush3.bf16.msra.mxu1 %v1299_v45 }
 0x6a2   :  { %2554 = vmatprep.subr.msk.bf16.mxu1 %vm1206_vm12, %v1301_v50  ;;  %v1044_v52 = vmul.f32 %v2643_v46, %v2215_v27 }
 0x6a4   :  { %v3651_v36 = vadd.f32 %v1044_v52, %v1043_v51 }
 0x6a5   :  { %2450 = vmatpush3.bf16.msra.mxu1 %v1310_v54 }
 0x6a8   :  { %2452 = vmatmul.mubr.msk.bf16.vlgmr.msra.gmra.mrb[24].mxu1 %vm1199_vm11, %v3649_v58 }
 0x6a9   :  { %2467 = vmatprep.mubr.msk.bf16.mxu1 %vm1199_vm11, %v3617_v0 }
 0x708   :  { %v2445_v61 = vpop.f32.mrb[20].mxu0 }
 0x709   :  { %vm1260_vm13 = vcmp.ge.f32.partialorder %v2445_v61, 0.0  ;;  %v1263_v62 = vmul.f32 %v2445_v61, %v3483_v16  ;;  %v1244_v63 = vpop.f32.mrb[21].mxu0 }
 0x70a   :  { %vm1258_vm14 = vcmp.ge.f32.partialorder %v1244_v63, 0.0  ;;  %v1261_v1 = vmul.f32 %v1244_v63, %v3483_v16  ;;  %v2446_v2 = vpop.f32.mrb[22].mxu0 }
 0x70b   :  { %v3662_v3 = vsel %vm1260_vm13, %v2445_v61, %v1263_v62  ;;  %v1247_v4 = vpop.f32.mrb[23].mxu0 }
 0x70c   :  { %v3664_v7 = vsel %vm1258_vm14, %v1244_v63, %v1261_v1  ;;  %vm1259_vm15 = vcmp.ge.f32.partialorder %v1247_v4, 0.0  ;;  %v1262_v0 = vmul.f32 %v1247_v4, %v3483_v16  ;;  %v1395_v10 = vpack.c.bf16 %v3662_v3, %v3662_v3 }
 0x70d   :  { %v1267_v9 = vmul.f32 %v3664_v7, %v3664_v7  ;;  %v1269_v15 = vmul.f32 %v3662_v3, %v3662_v3 }
 0x70e   :  { %v3671_v11 = vsel %vm1259_vm15, %v1247_v4, %v1262_v0 }
 0x70f   :  { %v1394_v12 = vpack.c.bf16 %v3671_v11, %v3664_v7  ;;  %v1270_v13 = vsel %vm298_vm1, %v1267_v9, 0.0  ;;  %v1268_v14 = vmul.f32 %v3671_v11, %v3671_v11  ;;  %v1276_v19 = vsel %vm298_vm1, %v1269_v15, 0.0 }
 0x710   :  { %1271 = vadd.xlane.f32.xlu1 %v1270_v13 }
 0x711   :  { %2459 = vmatprep.mubr.msk.bf16.mxu0 %vm298_vm1, %v1394_v12  ;;  %v1273_v18 = vsel %vm298_vm1, %v1268_v14, 0.0 }
 0x712   :  { %2460 = vmatmul.mubr.msk.bf16.vlgmr.msra.gmra.mrb[24].mxu0 %vm298_vm1, %v1395_v10  ;;  %1274 = vadd.xlane.f32.xlu0 %v1273_v18 }
 0x713   :  { %2472 = vmatpush3.bf16.msra.mxu0 %v2612_v39 }
 0x714   :  { %2473 = vmatprep.subr.bf16.mxu0 %v2613_v17 }
 0x716   :  { %1277 = vadd.xlane.f32.xlu0 %v1276_v19 }
 0x717   :  { %2474 = vmatpush3.bf16.msra.mxu0 %v2613_v17 }
 0x718   :  { %2487 = vmatprep.subr.bf16.mxu0 %v2614_v42 }
 0x77b   :  { %v2453_v21 = vpop.f32.mrb[24].mxu1 }
 0x77c   :  { %v1365_v22 = vmul.f32 %v2453_v21, %v3483_v16  ;;  %v1346_v23 = vpop.f32.mrb[25].mxu1  ;;  %vm1362_vm0 = vcmp.ge.f32.partialorder %v2453_v21, 0.0 }
 0x77d   :  { %vm1360_vm2 = vcmp.ge.f32.partialorder %v1346_v23, 0.0  ;;  %v1363_v24 = vmul.f32 %v1346_v23, %v3483_v16  ;;  %v2454_v25 = vpop.f32.mrb[26].mxu1 }
 0x77e   :  { %v1349_v5 = vpop.f32.mrb[27].mxu1  ;;  %v1368_v28 = vsel %vm1362_vm0, %v2453_v21, %v1365_v22 }
 0x77f   :  { %v1366_v26 = vsel %vm1360_vm2, %v1346_v23, %v1363_v24  ;;  %vm1361_vm3 = vcmp.ge.f32.partialorder %v1349_v5, 0.0  ;;  %v1364_v27 = vmul.f32 %v1349_v5, %v3483_v16  ;;  %v1550_v37 = vpack.c.bf16 %v1368_v28, %v1368_v28 }
 0x780   :  { %v1369_v29 = vmul.f32 %v1366_v26, %v1366_v26  ;;  %v1371_v40 = vmul.f32 %v1368_v28, %v1368_v28 }
 0x781   :  { %v1367_v30 = vsel %vm1361_vm3, %v1349_v5, %v1364_v27 }
 0x782   :  { %v1549_v31 = vpack.c.bf16 %v1367_v30, %v1366_v26  ;;  %v1372_v34 = vsel %vm298_vm1, %v1369_v29, 0.0  ;;  %v1370_v35 = vmul.f32 %v1367_v30, %v1367_v30  ;;  %v1378_v41 = vsel %vm298_vm1, %v1371_v40, 0.0 }
 0x783   :  { %1373 = vadd.xlane.f32.xlu1 %v1372_v34 }
 0x784   :  { %2475 = vmatprep.mubr.msk.bf16.mxu0 %vm298_vm1, %v1549_v31  ;;  %v1375_v38 = vsel %vm298_vm1, %v1370_v35, 0.0 }
 0x785   :  { %2476 = vmatmul.mubr.msk.bf16.vlgmr.msra.gmra.mrb[28].mxu0 %vm298_vm1, %v1550_v37 }
 0x786   :  { %2491 = vmatprep.mubr.msk.bf16.mxu0 %vm298_vm1, %v3581_v49  ;;  %2488 = vmatpush3.bf16.msra.mxu0 %v2614_v42  ;;  %v3703_v49 = vld [vmem:[#allocation24 + $0x8] sm:$0xff]  }
 0x787   :  { %1376 = vadd.xlane.f32.xlu1 %v1375_v38  ;;  %2489 = vmatprep.subr.bf16.mxu0 %v2615_v43 }
 0x78a   :  { %2490 = vmatpush3.bf16.msra.mxu0 %v2615_v43 }
 0x78b   :  { %1379 = vadd.xlane.f32.xlu1 %v1378_v41  ;;  %2511 = vmatprep.subr.bf16.mxu0 %v3697_v44 }
 0x78d   :  { %2492 = vmatmul.mubr.msk.bf16.vlgmr.msra.gmra.mrb[32].mxu0 %vm298_vm1, %v3598_v57 }
 0x78e   :  { %2512 = vmatpush3.bf16.msra.mxu0 %v3697_v44 }
 0x78f   :  { %2513 = vmatprep.subr.bf16.mxu0 %v3703_v49 }
 0x792   :  { %2514 = vmatpush3.bf16.msra.mxu0 %v3703_v49 }
 0x79d   :  { %v1272_v39 = vpop.xlane.xlu1 %1271 }
 0x79e   :  { %v1279_v18 = vmax.f32 %v1272_v39, 1e-24 }
 0x79f   :  { %v1275_v15 = vpop.xlane.xlu0 %1274 }
 0x7a0   :  { %v1280_v17 = vmax.f32 %v1275_v15, 1e-24 }
 0x7a3   :  { %v1278_v19 = vpop.xlane.xlu0 %1277 }
 0x7a4   :  { %v1281_v21 = vmax.f32 %v1278_v19, 1e-24  ;;  %v2618_v19 = vld [vmem:[#allocation26] sm:$0xff]  }
 0x7a5   :  { %2519 = vmatprep.subr.bf16.mxu0 %v2618_v19 }
 0x7e5   :  { %v2461_v45 = vpop.f32.mrb[24].mxu0 }
 0x7e6   :  { %v1448_v46 = vpop.f32.mrb[25].mxu0  ;;  %v1463_v52 = vpack.c.bf16 %v2461_v45, %v2461_v45 }
 0x7e7   :  { %v2462_v50 = vpop.f32.mrb[26].mxu0 }
 0x7e8   :  { %v1451_v51 = vpop.f32.mrb[27].mxu0  ;;  %v1465_v57 = vsel %vm1206_vm12, %v1463_v52, 0 }
 0x7e9   :  { %v1462_v54 = vpack.c.bf16 %v1451_v51, %v1448_v46 }
 0x7eb   :  { %2463 = vmatprep.subr.bf16.mxu1 %v1462_v54 }
 0x7ec   :  { %2464 = vmatpush3.bf16.msra.mxu1 %v1462_v54 }
 0x7ed   :  { %2555 = vmatprep.subr.msk.bf16.mxu1 %vm1206_vm12, %v1463_v52 }
 0x7f0   :  { %2466 = vmatpush3.bf16.msra.mxu1 %v1465_v57 }
 0x7f3   :  { %2468 = vmatmul.mubr.msk.bf16.vlgmr.msra.gmra.mrb[28].mxu1 %vm1199_vm11, %v3638_v32 }
 0x7f4   :  { %2483 = vmatprep.mubr.msk.bf16.mxu1 %vm1199_vm11, %v3627_v20 }
 0x810   :  { %v1374_v61 = vpop.xlane.xlu1 %1373 }
 0x811   :  { %v1381_v62 = vmax.f32 %v1374_v61, 1e-24 }
 0x813   :  { %2644 = vrsqrt.f32 %v1381_v62 }
 0x814   :  { %v1377_v63 = vpop.xlane.xlu1 %1376 }
 0x815   :  { %v1382_v1 = vmax.f32 %v1377_v63, 1e-24 }
 0x817   :  { %2646 = vrsqrt.f32 %v1382_v1 }
 0x818   :  { %v1380_v2 = vpop.xlane.xlu1 %1379 }
 0x819   :  { %v1383_v4 = vmax.f32 %v1380_v2, 1e-24 }
 0x81b   :  { %2648 = vrsqrt.f32 %v1383_v4 }
 0x81c   :  { %2650 = vrsqrt.f32 %v1280_v17 }
 0x81d   :  { %v2645_v0 = vpop.eup %2644  ;;  %2652 = vrsqrt.f32 %v1279_v18 }
 0x81e   :  { %v3713_v10 = vmul.f32 %v2645_v0, %v1366_v26  ;;  %2654 = vrsqrt.f32 %v1281_v21 }
 0x821   :  { %v2647_v9 = vpop.eup %2646 }
 0x822   :  { %v3715_v12 = vmul.f32 %v2647_v9, %v1367_v30 }
 0x824   :  { %v1947_v32 = vpack.c.bf16 %v3715_v12, %v3713_v10 }
 0x825   :  { %v2649_v20 = vpop.eup %2648 }
 0x826   :  { %v3719_v13 = vmul.f32 %v2649_v20, %v1368_v28  ;;  %2515 = vmatprep.mubr.msk.bf16.mxu0 %vm298_vm1, %v1947_v32  ;;  %v2651_v26 = vpop.eup %2650 }
 0x827   :  { %v2653_v28 = vpop.eup %2652  ;;  %v3727_v29 = vmul.f32 %v2651_v26, %v3671_v11 }
 0x828   :  { %v1948_v14 = vpack.c.bf16 %v3719_v13, %v3719_v13  ;;  %v3731_v31 = vmul.f32 %v2653_v28, %v3664_v7  ;;  %v2655_v34 = vpop.eup %2654 }
 0x829   :  { %v3741_v11 = vmul.f32 %v2655_v34, %v3662_v3 }
 0x82a   :  { %2516 = vmatmul.mubr.msk.bf16.vlgmr.msra.gmra.mrb[36].mxu0 %vm298_vm1, %v1948_v14  ;;  %v1772_v35 = vpack.c.bf16 %v3727_v29, %v3731_v31 }
 0x82b   :  { %v1773_v7 = vpack.c.bf16 %v3741_v11, %v3741_v11  ;;  %2520 = vmatpush3.bf16.msra.mxu0 %v2618_v19 }
 0x858   :  { %v2477_v22 = vpop.f32.mrb[28].mxu0 }
 0x859   :  { %v1603_v23 = vpop.f32.mrb[29].mxu0  ;;  %v1618_v27 = vpack.c.bf16 %v2477_v22, %v2477_v22 }
 0x85a   :  { %v2478_v24 = vpop.f32.mrb[30].mxu0 }
 0x85b   :  { %v1606_v25 = vpop.f32.mrb[31].mxu0  ;;  %v1620_v30 = vsel %vm1206_vm12, %v1618_v27, 0  ;;  %v2619_v24 = vld [vmem:[#allocation26 + $0x8] sm:$0xff]  }
 0x85c   :  { %v1617_v5 = vpack.c.bf16 %v1606_v25, %v1603_v23  ;;  %2521 = vmatprep.subr.bf16.mxu0 %v2619_v24 }
 0x85d   :  { %2522 = vmatpush3.bf16.msra.mxu0 %v2619_v24 }
 0x85e   :  { %2479 = vmatprep.subr.bf16.mxu1 %v1617_v5 }
 0x85f   :  { %2480 = vmatpush3.bf16.msra.mxu1 %v1617_v5 }
 0x860   :  { %2556 = vmatprep.subr.msk.bf16.mxu1 %vm1206_vm12, %v1618_v27  ;;  %v3785_v27 = vpop.f32.mrb[32].mxu0 }
 0x861   :  { %v3787_v28 = vpop.f32.mrb[33].mxu0 }
 0x863   :  { %2482 = vmatpush3.bf16.msra.mxu1 %v1620_v30  ;;  %v2494_v30 = vpop.f32.mrb[34].mxu0 }
 0x864   :  { %2495 = vmatprep.subr.bf16.mxu1 %v3697_v44  ;;  %v3789_v34 = vpop.f32.mrb[35].mxu0 }
 0x866   :  { %2484 = vmatmul.mubr.msk.bf16.vlgmr.msra.gmra.mrb[32].mxu1 %vm1199_vm11, %v3649_v58  ;;  %vm1104_vm11 = vcmask 785920  }
 0x867   :  { %2496 = vmatpush3.bf16.msra.mxu1 %v3697_v44  ;;  %2499 = vmatprep.mubr.msk.bf16.mxu1 %vm298_vm1, %v1772_v35 }
 0x868   :  { %2497 = vmatprep.subr.bf16.mxu1 %v3703_v49 }
 0x86b   :  { %2498 = vmatpush3.bf16.msra.mxu1 %v3703_v49 }
 0x86c   :  { %2503 = vmatprep.subr.bf16.mxu1 %v2618_v19 }
 0x86e   :  { %2500 = vmatmul.mubr.msk.bf16.vlgmr.msra.gmra.mrb[36].mxu1 %vm298_vm1, %v1773_v7 }
 0x86f   :  { %2504 = vmatpush3.bf16.msra.mxu1 %v2618_v19 }
 0x870   :  { %2505 = vmatprep.subr.bf16.mxu1 %v2619_v24 }
 0x873   :  { %2506 = vmatpush3.bf16.msra.mxu1 %v2619_v24 }
 0x8c6   :  { %v2469_v37 = vpop.f32.mrb[28].mxu1 }
 0x8c7   :  { %v1501_v38 = vpop.f32.mrb[29].mxu1  ;;  %v1520_v50 = vmul.f32 %v2469_v37, %v3483_v16  ;;  %vm1517_vm6 = vcmp.ge.f32.partialorder %v2469_v37, 0.0 }
 0x8c8   :  { %vm1515_vm4 = vcmp.ge.f32.partialorder %v1501_v38, 0.0  ;;  %v1518_v58 = vmul.f32 %v1501_v38, %v3483_v16  ;;  %v2470_v40 = vpop.f32.mrb[30].mxu1 }
 0x8c9   :  { %v1504_v41 = vpop.f32.mrb[31].mxu1  ;;  %v3758_v1 = vsel %vm1517_vm6, %v2469_v37, %v1520_v50 }
 0x8ca   :  { %vm1516_vm5 = vcmp.ge.f32.partialorder %v1504_v41, 0.0  ;;  %v1519_v3 = vmul.f32 %v1504_v41, %v3483_v16  ;;  %v1521_v42 = vsel %vm1515_vm4, %v1501_v38, %v1518_v58  ;;  %v1526_v20 = vmul.f32 %v3758_v1, %v3758_v1 }
 0x8cb   :  { %v1524_v43 = vmul.f32 %v1521_v42, %v1521_v42 }
 0x8cc   :  { %v1522_v44 = vsel %vm1516_vm5, %v1504_v41, %v1519_v3  ;;  %v1533_v15 = vsel %vm298_vm1, %v1526_v20, 0.0 }
 0x8cd   :  { %v1527_v49 = vsel %vm298_vm1, %v1524_v43, 0.0  ;;  %v1525_v45 = vmul.f32 %v1522_v44, %v1522_v44 }
 0x8ce   :  { %1528 = vadd.xlane.f32.xlu0 %v1527_v49 }
 0x8cf   :  { %v1530_v46 = vsel %vm298_vm1, %v1525_v45, 0.0 }
 0x8d0   :  { %1531 = vadd.xlane.f32.xlu1 %v1530_v46 }
 0x939   :  { %v2485_v51 = vpop.f32.mrb[32].mxu1 }
 0x93a   :  { %v1656_v52 = vpop.f32.mrb[33].mxu1  ;;  %v1675_v54 = vmul.f32 %v2485_v51, %v3483_v16  ;;  %vm1672_vm8 = vcmp.ge.f32.partialorder %v2485_v51, 0.0 }
 0x93b   :  { %vm1670_vm7 = vcmp.ge.f32.partialorder %v1656_v52, 0.0  ;;  %v1673_v57 = vmul.f32 %v1656_v52, %v3483_v16  ;;  %v2486_v39 = vpop.f32.mrb[34].mxu1 }
 0x93c   :  { %v1659_v61 = vpop.f32.mrb[35].mxu1  ;;  %v3764_v0 = vsel %vm1672_vm8, %v2485_v51, %v1675_v54 }
 0x93d   :  { %vm1671_vm9 = vcmp.ge.f32.partialorder %v1659_v61, 0.0  ;;  %v1674_v62 = vmul.f32 %v1659_v61, %v3483_v16  ;;  %v3756_v63 = vsel %vm1670_vm7, %v1656_v52, %v1673_v57  ;;  %v1681_v14 = vmul.f32 %v3764_v0, %v3764_v0 }
 0x93e   :  { %v1679_v2 = vmul.f32 %v3756_v63, %v3756_v63 }
 0x93f   :  { %v3762_v4 = vsel %vm1671_vm9, %v1659_v61, %v1674_v62  ;;  %v1688_v17 = vsel %vm298_vm1, %v1681_v14, 0.0 }
 0x940   :  { %v1682_v9 = vsel %vm298_vm1, %v1679_v2, 0.0  ;;  %v1680_v32 = vmul.f32 %v3762_v4, %v3762_v4 }
 0x941   :  { %1683 = vadd.xlane.f32.xlu0 %v1682_v9 }
 0x942   :  { %v1685_v16 = vsel %vm298_vm1, %v1680_v32, 0.0 }
 0x943   :  { %1686 = vadd.xlane.f32.xlu1 %v1685_v16 }
 0x945   :  { %1534 = vadd.xlane.f32.xlu0 %v1533_v15 }
 0x947   :  { %1689 = vadd.xlane.f32.xlu1 %v1688_v17 }
 0x949   :  { %936 = vadd.xlane.f32.xlu0 %v3640_v33 }
 0x94b   :  { %1046 = vadd.xlane.f32.xlu1 %v3651_v36 }
 0x95b   :  { %v1529_v18 = vpop.xlane.xlu0 %1528 }
 0x95c   :  { %v1536_v21 = vmax.f32 %v1529_v18, 1e-24 }
 0x95d   :  { %v1532_v22 = vpop.xlane.xlu1 %1531 }
 0x95e   :  { %2656 = vrsqrt.f32 %v1536_v21  ;;  %v1537_v23 = vmax.f32 %v1532_v22, 1e-24 }
 0x960   :  { %2658 = vrsqrt.f32 %v1537_v23 }
 0x968   :  { %v2657_v25 = vpop.eup %2656 }
 0x969   :  { %v3778_v5 = vmul.f32 %v2657_v25, %v1521_v42 }
 0x96a   :  { %v2659_v33 = vpop.eup %2658 }
 0x96b   :  { %v3780_v36 = vmul.f32 %v2659_v33, %v1522_v44 }
 0x96d   :  { %v1847_v26 = vpack.c.bf16 %v3780_v36, %v3778_v5 }
 0x96f   :  { %2507 = vmatprep.mubr.msk.bf16.mxu1 %vm298_vm1, %v1847_v26 }
 0x9ce   :  { %v1684_v35 = vpop.xlane.xlu0 %1683 }
 0x9cf   :  { %v1691_v7 = vmax.f32 %v1684_v35, 1e-24 }
 0x9d0   :  { %v1687_v37 = vpop.xlane.xlu1 %1686 }
 0x9d1   :  { %2660 = vrsqrt.f32 %v1691_v7  ;;  %v1692_v38 = vmax.f32 %v1687_v37, 1e-24 }
 0x9d2   :  { %v1535_v58 = vpop.xlane.xlu0 %1534 }
 0x9d3   :  { %2662 = vrsqrt.f32 %v1692_v38  ;;  %v1538_v40 = vmax.f32 %v1535_v58, 1e-24 }
 0x9d4   :  { %v1690_v41 = vpop.xlane.xlu1 %1689 }
 0x9d5   :  { %2664 = vrsqrt.f32 %v1538_v40  ;;  %v1693_v3 = vmax.f32 %v1690_v41, 1e-24 }
 0x9d6   :  { %v937_v42 = vpop.xlane.xlu0 %936 }
 0x9d7   :  { %2666 = vrsqrt.f32 %v1693_v3  ;;  %v938_v43 = vrot.slane %v937_v42, 4 }
 0x9d8   :  { %v1047_v44 = vpop.xlane.xlu1 %1046 }
 0x9d9   :  { %v939_v49 = vadd.f32 %v938_v43, %v937_v42  ;;  %v1048_v45 = vrot.slane %v1047_v44, 4 }
 0x9db   :  { %v2661_v46 = vpop.eup %2660  ;;  %v940_v50 = vrot.slane %v939_v49, 2  ;;  %v1049_v51 = vadd.f32 %v1048_v45, %v1047_v44 }
 0x9dc   :  { %v3792_v39 = vmul.f32 %v2661_v46, %v3756_v63 }
 0x9dd   :  { %v2663_v52 = vpop.eup %2662  ;;  %v1050_v54 = vrot.slane %v1049_v51, 2  ;;  %v941_v57 = vadd.f32 %v940_v50, %v939_v49 }
 0x9de   :  { %v3795_v61 = vmul.f32 %v2663_v52, %v3762_v4 }
 0x9df   :  { %v2665_v62 = vpop.eup %2664  ;;  %v942_v2 = vrot.slane %v941_v57, 1  ;;  %v1051_v9 = vadd.f32 %v1050_v54, %v1049_v51 }
 0x9e0   :  { %v3798_v32 = vmul.f32 %v2665_v62, %v3758_v1  ;;  %v2006_v20 = vpack.c.bf16 %v3795_v61, %v3792_v39 }
 0x9e1   :  { %v2667_v16 = vpop.eup %2666  ;;  %v943_v14 = vadd.f32 %v942_v2, %v941_v57  ;;  %v1052_v15 = vrot.slane %v1051_v9, 1 }
 0x9e2   :  { %v3803_v17 = vmul.f32 %v2667_v16, %v3764_v0  ;;  %2523 = vmatprep.mubr.msk.bf16.mxu0 %vm298_vm1, %v2006_v20  ;;  %v1848_v63 = vpack.c.bf16 %v3798_v32, %v3798_v32 }
 0x9e3   :  { %2557 = vpush %v943_v14  ;;  %v1053_v4 = vadd.f32 %v1052_v15, %v1051_v9 }
 0x9e4   :  { %2508 = vmatmul.mubr.msk.bf16.vlgmr.msra.gmra.mrb[36].mxu1 %vm298_vm1, %v1848_v63  ;;  %v2007_v1 = vpack.c.bf16 %v3803_v17, %v3803_v17 }
 0x9e5   :  { %2559 = vpush %v1053_v4 }
 0x9e6   :  { %2524 = vmatmul.mubr.msk.bf16.vlgmr.msra.gmra.mrb[36].mxu0 %vm298_vm1, %v2007_v1 }
 0xa14   :  { %s2558_s15 = spop %2557 }
 0xa15   :  { %v945_v18 = vstv %s2558_s15 }
 0xa16   :  { %s2560_s30 = spop %2559  ;;  %v946_v19 = vmul.f32 0.0625, %v945_v18 }
 0xa17   :  { %v1055_v0 = vstv %s2560_s30 }
 0xa18   :  { %v1056_v21 = vmul.f32 0.0625, %v1055_v0 }
 0xa1a   :  { %v1057_v22 = vmax.f32 %v946_v19, %v1056_v21 }
 0xa1c   :  { %v1058_v23 = vsub.f32 %v946_v19, %v1057_v22  ;;  %v1061_v24 = vsub.f32 %v1056_v21, %v1057_v22 }
 0xa1e   :  { %v1059_v25 = vmul.f32 1.442695, %v1058_v23  ;;  %v1062_v33 = vmul.f32 1.442695, %v1061_v24 }
 0xa20   :  { %2668 = vpow2.f32 %v1059_v25 }
 0xa21   :  { %2670 = vpow2.f32 %v1062_v33 }
 0xa2a   :  { %v2669_v26 = vpop.eup %2668 }
 0xa2b   :  { %v2671_v30 = vpop.eup %2670 }
 0xa2c   :  { %v1064_v35 = vadd.f32 %v2671_v30, %v2669_v26 }
 0xa2e   :  { %2672 = vrcp.f32 %v1064_v35 }
 0xa38   :  { %v2673_v7 = vpop.eup %2672 }
 0xa39   :  { %v1066_v37 = vmul.f32 %v2673_v7, %v2669_v26  ;;  %v1067_v38 = vmul.f32 %v2673_v7, %v2671_v30 }
 0xa3b   :  { %v1074_v58 = vmul.f32 %v1066_v37, %v3526_v59  ;;  %v1076_v40 = vmul.f32 %v1067_v38, %v3594_v56  ;;  %v1073_v41 = vmul.f32 %v1066_v37, %v3530_v60  ;;  %v1075_v3 = vmul.f32 %v1067_v38, %v3591_v55  ;;  %v2692_v59 = vld [vmem:[#allocation6] sm:$0xff]  ;;  %v2693_v56 = vld [vmem:[#allocation6 + $0x8] sm:$0xff]  ;;  %v2245_v60 = vld [vmem:[%s3916_s19] ss:$0 sm:$0xff] }
 0xa3c   :  { %v1091_v42 = vmul.f32 %v1066_v37, %v3579_v48  ;;  %v1093_v43 = vmul.f32 %v1067_v38, %v3612_v8  ;;  %v1090_v44 = vmul.f32 %v1066_v37, %v3576_v47  ;;  %v1092_v49 = vmul.f32 %v1067_v38, %v3610_v6 }
 0xa3d   :  { %v1078_v45 = vadd.f32 %v1076_v40, %v1074_v58  ;;  %v1077_v46 = vadd.f32 %v1075_v3, %v1073_v41  ;;  %v1068_v50 = vadd.f32 %v1067_v38, %v1066_v37  ;;  %v1767_v47 = vadd.f32 %v3785_v27, %v2245_v60 }
 0xa3e   :  { %v1095_v51 = vadd.f32 %v1093_v43, %v1091_v42  ;;  %v1094_v52 = vadd.f32 %v1092_v49, %v1090_v44  ;;  %v1759_v48 = vadd.f32 %v2245_v60, %v3787_v28  ;;  %v1762_v62 = vadd.f32 %v2245_v60, %v3789_v34  ;;  %v2258_v34 = vld [vmem:[%s3945_s23] ss:$0 sm:$0xff] }
 0xa3f   :  { %v1069_v54 = vmul.f32 %v2692_v59, %v1068_v50  ;;  %v1070_v57 = vmul.f32 %v2693_v56, %v1068_v50 }
 0xa41   :  { %1071 = vst.msk [vmem:[#allocation27] sm:$0xff] %vm298_vm1, %v1069_v54  ;;  %1072 = vst.msk [vmem:[#allocation27 + $0x8] sm:$0xff] %vm298_vm1, %v1070_v57 }
 0xab7   :  { %v2509_v55 = vpop.f32.mrb[36].mxu1 }
 0xab8   :  { %v2531_v6 = vadd.f32 %v2509_v55, %v1767_v47  ;;  %v1905_v8 = vpop.f32.mrb[37].mxu1 }
 0xab9   :  { %v2532_v2 = vadd.f32 %v1905_v8, %v1759_v48  ;;  %v2510_v9 = vpop.f32.mrb[38].mxu1  ;;  %v2525_v20 = vpop.f32.mrb[36].mxu0 }
 0xaba   :  { %2674 = vtanh.f32 %v2531_v6  ;;  %v2534_v16 = vadd.f32 %v2525_v20, %v1767_v47  ;;  %v1908_v14 = vpop.f32.mrb[39].mxu1  ;;  %v2048_v15 = vpop.f32.mrb[37].mxu0 }
 0xabb   :  { %2676 = vtanh.f32 %v2532_v2  ;;  %v2533_v63 = vadd.f32 %v1908_v14, %v1762_v62  ;;  %v2535_v4 = vadd.f32 %v2048_v15, %v1759_v48  ;;  %v2526_v1 = vpop.f32.mrb[38].mxu0 }
 0xabc   :  { %2678 = vtanh.f32 %v2534_v16  ;;  %v2051_v27 = vpop.f32.mrb[39].mxu0 }
 0xabd   :  { %2680 = vtanh.f32 %v2533_v63  ;;  %v2536_v28 = vadd.f32 %v2051_v27, %v1762_v62 }
 0xabe   :  { %2682 = vtanh.f32 %v2535_v4 }
 0xabf   :  { %2684 = vtanh.f32 %v2536_v28 }
 0xac4   :  { %v2675_v18 = vpop.eup %2674 }
 0xac5   :  { %v2677_v0 = vpop.eup %2676  ;;  %v1933_v33 = vmul.f32 %v2675_v18, %v2258_v34 }
 0xac6   :  { %v2679_v19 = vpop.eup %2678  ;;  %v1931_v23 = vmul.f32 %v2677_v0, %v2258_v34 }
 0xac7   :  { %v2681_v21 = vpop.eup %2680  ;;  %v2070_v37 = vmul.f32 %v2679_v19, %v2258_v34 }
 0xac8   :  { %v2683_v22 = vpop.eup %2682  ;;  %v1932_v24 = vmul.f32 %v2681_v21, %v2258_v34 }
 0xac9   :  { %v2685_v25 = vpop.eup %2684  ;;  %v2068_v30 = vmul.f32 %v2683_v22, %v2258_v34 }
 0xaca   :  { %v1934_v26 = vadd.f32 %v1932_v24, %v1931_v23  ;;  %v2069_v35 = vmul.f32 %v2685_v25, %v2258_v34 }
 0xacc   :  { %v1935_v7 = vadd.f32 %v1934_v26, %v1933_v33  ;;  %v2071_v38 = vadd.f32 %v2069_v35, %v2068_v30 }
 0xace   :  { %1936 = vadd.xlane.f32.xlu0 %v1935_v7  ;;  %v2072_v58 = vadd.f32 %v2071_v38, %v2070_v37 }
 0xad0   :  { %2073 = vadd.xlane.f32.xlu1 %v2072_v58 }
 0xae1   :  { %1083 = vrot.lane.b32.xlu1 %v1078_v45, %s3112_s18 }
 0xae4   :  { %1081 = vrot.lane.b32.xlu0 %v1077_v46, %s3112_s18 }
 0xae5   :  { %1100 = vrot.lane.b32.xlu1 %v1095_v51, %s3095_s4 }
 0xae8   :  { %1098 = vrot.lane.b32.xlu0 %v1094_v52, %s3095_s4 }
 0xb5b   :  { %v1937_v40 = vpop.xlane.xlu0 %1936 }
 0xb5c   :  { %v1938_v41 = vrot.slane %v1937_v40, 4 }
 0xb5d   :  { %v2074_v3 = vpop.xlane.xlu1 %2073 }
 0xb5e   :  { %v1939_v42 = vadd.f32 %v1938_v41, %v1937_v40  ;;  %v2075_v43 = vrot.slane %v2074_v3, 4 }
 0xb5f   :  { %v1082_v44 = vpop.permute.xlu0 %1081 }
 0xb60   :  { %v1940_v49 = vrot.slane %v1939_v42, 2  ;;  %v2076_v50 = vadd.f32 %v2075_v43, %v2074_v3  ;;  %1088 = vst.msk [vmem:[#allocation27] sm:$0xff] %vm1087_vm10, %v1082_v44 }
 0xb61   :  { %v1084_v59 = vpop.permute.xlu1 %1083 }
 0xb62   :  { %v2077_v45 = vrot.slane %v2076_v50, 2  ;;  %1089 = vst.msk [vmem:[#allocation27 + $0x8] sm:$0xff] %vm1087_vm10, %v1084_v59  ;;  %v1941_v46 = vadd.f32 %v1940_v49, %v1939_v42 }
 0xb63   :  { %v1099_v51 = vpop.permute.xlu0 %1098 }
 0xb64   :  { %v1942_v54 = vrot.slane %v1941_v46, 1  ;;  %v2078_v52 = vadd.f32 %v2077_v45, %v2076_v50  ;;  %1105 = vst.msk [vmem:[#allocation27] sm:$0xff] %vm1104_vm11, %v1099_v51 }
 0xb65   :  { %v1101_v56 = vpop.permute.xlu1 %1100 }
 0xb66   :  { %v1943_v57 = vadd.f32 %v1942_v54, %v1941_v46  ;;  %v2079_v60 = vrot.slane %v2078_v52, 1  ;;  %1106 = vst.msk [vmem:[#allocation27 + $0x8] sm:$0xff] %vm1104_vm11, %v1101_v56 }
 0xb68   :  { %2561 = vpush %v1943_v57  ;;  %v2080_v47 = vadd.f32 %v2079_v60, %v2078_v52 }
 0xb6a   :  { %2563 = vpush %v2080_v47 }
 0xb99   :  { %s2562_s2 = spop %2561 }
 0xb9a   :  { %v1945_v48 = vstv %s2562_s2 }
 0xb9b   :  { %s2564_s14 = spop %2563  ;;  %v1946_v6 = vmul.f32 0.041666668, %v1945_v48 }
 0xb9c   :  { %v2082_v55 = vstv %s2564_s14 }
 0xb9d   :  { %v2083_v8 = vmul.f32 0.041666668, %v2082_v55 }
 0xb9f   :  { %v2084_v62 = vmax.f32 %v1946_v6, %v2083_v8 }
 0xba1   :  { %v2085_v2 = vsub.f32 %v1946_v6, %v2084_v62  ;;  %v2088_v9 = vsub.f32 %v2083_v8, %v2084_v62 }
 0xba3   :  { %v2086_v20 = vmul.f32 1.442695, %v2085_v2  ;;  %v2089_v16 = vmul.f32 1.442695, %v2088_v9 }
 0xba5   :  { %2686 = vpow2.f32 %v2086_v20 }
 0xba6   :  { %2688 = vpow2.f32 %v2089_v16 }
 0xbaf   :  { %v2687_v14 = vpop.eup %2686 }
 0xbb0   :  { %v2689_v15 = vpop.eup %2688 }
 0xbb1   :  { %v2091_v63 = vadd.f32 %v2689_v15, %v2687_v14 }
 0xbb3   :  { %2690 = vrcp.f32 %v2091_v63 }
 0xbbd   :  { %v2691_v4 = vpop.eup %2690 }
 0xbbe   :  { %v2093_v1 = vmul.f32 %v2691_v4, %v2687_v14  ;;  %v2094_v27 = vmul.f32 %v2691_v4, %v2689_v15 }
 0xbc0   :  { %v2103_v28 = vmul.f32 %v2093_v1, %v3727_v29  ;;  %v2106_v18 = vmul.f32 %v2094_v27, %v3715_v12  ;;  %v2102_v0 = vmul.f32 %v2093_v1, %v3731_v31  ;;  %v2105_v34 = vmul.f32 %v2094_v27, %v3713_v10 }
 0xbc1   :  { %v2126_v19 = vmul.f32 %v2093_v1, %v3778_v5  ;;  %v2129_v21 = vmul.f32 %v2094_v27, %v3792_v39  ;;  %v2104_v22 = vmul.f32 %v2093_v1, %v3741_v11  ;;  %v2107_v23 = vmul.f32 %v2094_v27, %v3719_v13 }
 0xbc2   :  { %v2109_v24 = vadd.f32 %v2106_v18, %v2103_v28  ;;  %v2108_v25 = vadd.f32 %v2105_v34, %v2102_v0 }
 0xbc3   :  { %3037 = shalt.err (!%p3034_p12)
}
 0xbc4   :  { %s3946_s0 = sld [smem:[#allocation48_spill]] }
 0xbca   :  { %s3038_s1 = scalar_lea.hbm %s3946_s0, 256 }
 0xbcb   :  { %p3039_p13 = scmp.ne.s32.totalorder %s3946_s0, %s3038_s1  ;;  %p3042_p0 = scmp.lt.u32.totalorder %s3038_s1, %s3946_s0 }
 0xbcd   :  { %p3044_p1 = pnand %p3042_p0, %p3039_p13 }
 0xbcf   :  { %3047 = shalt.err (!%p3044_p1)
}
 0xbd0   :  { %2161 = dma.vmem_to_hbm [thread:$0]  %s2156_s20, 256, %s3946_s0, [#allocation5], %s3091_s25, %s3091_s25, %s3092_s26   ;;  %v2128_v10 = vmul.f32 %v2093_v1, %v3798_v32  ;;  %v2095_v12 = vadd.f32 %v2094_v27, %v2093_v1  ;;  %v2132_v13 = vadd.f32 %v2129_v21, %v2126_v19  ;;  %v2110_v29 = vadd.f32 %v2107_v23, %v2104_v22  ;;  %v2694_v39 = vld [vmem:[#allocation18] sm:$0xff]  ;;  %v2695_v26 = vld [vmem:[#allocation18 + $0x8] sm:$0xff] }
 0xbd1   :  { %2116 = vrot.lane.b32.xlu0 %v2109_v24, %s3112_s18  ;;  %2114 = vrot.lane.b32.xlu1 %v2108_v25, %s3112_s18  ;;  %v2131_v31 = vmul.f32 %v2094_v27, %v3803_v17  ;;  %v2127_v11 = vmul.f32 %v2093_v1, %v3780_v36  ;;  %v2130_v5 = vmul.f32 %v2094_v27, %v3795_v61  ;;  %s3114_s22 = smov [#allocation28]  }
 0xbd2   :  { %v2096_v33 = vmul.f32 %v2694_v39, %v2095_v12  ;;  %v2097_v30 = vmul.f32 %v2695_v26, %v2095_v12  ;;  %v2098_v35 = vmul.f32 %v2095_v12, %v3588_v53  ;;  %s2167_s5 = sshll.u32 %s3114_s22, 4  ;;  %s2168_s5 = int_to_ptr.vmem [resolvable:$true] %s2167_s5 }
 0xbd3   :  { %v2134_v32 = vadd.f32 %v2131_v31, %v2128_v10  ;;  %v2133_v36 = vadd.f32 %v2130_v5, %v2127_v11  ;;  %p3053_p3 = scmp.lt.s32.totalorder %s2168_s5, %s2168_s5 }
 0xbd4   :  { %2099 = vst.msk [vmem:[#allocation28] sm:$0xff] %vm298_vm1, %v2096_v33  ;;  %2100 = vst.msk [vmem:[#allocation28 + $0x8] sm:$0xff] %vm298_vm1, %v2097_v30 }
 0xbd5   :  { %2138 = vrot.lane.b32.xlu0 %v2132_v13, %s3095_s4  ;;  %2118 = vrot.lane.b32.xlu1 %v2110_v29, %s3112_s18  ;;  %2101 = vst.msk [vmem:[#allocation28 + $0x10] sm:$0xff] %vm298_vm1, %v2098_v35 }
 0xbd9   :  { %2142 = vrot.lane.b32.xlu0 %v2134_v32, %s3095_s4  ;;  %2140 = vrot.lane.b32.xlu1 %v2133_v36, %s3095_s4  ;;  %s3048_s4 = scalar_lea.vmem %s2168_s5, 384 }
 0xbda   :  { %p3049_p2 = scmp.ne.s32.totalorder %s2168_s5, %s3048_s4  ;;  %p3054_p4 = scmp.lt.s32.totalorder %s3048_s4, %s3048_s4 }
 0xbdc   :  { %p3055_p5 = por %p3054_p4, %p3053_p3 }
 0xbde   :  { %p3056_p6 = pnand %p3055_p5, %p3049_p2 }
 0xc43   :  { %v2115_v61 = vpop.permute.xlu1 %2114  ;;  %v2117_v17 = vpop.permute.xlu0 %2116 }
 0xc44   :  { %2123 = vst.msk [vmem:[#allocation28] sm:$0xff] %vm1087_vm10, %v2115_v61  ;;  %2124 = vst.msk [vmem:[#allocation28 + $0x8] sm:$0xff] %vm1087_vm10, %v2117_v17 }
 0xc47   :  { %v2119_v53 = vpop.permute.xlu1 %2118  ;;  %v2139_v7 = vpop.permute.xlu0 %2138 }
 0xc48   :  { %2125 = vst.msk [vmem:[#allocation28 + $0x10] sm:$0xff] %vm1087_vm10, %v2119_v53 }
 0xc49   :  { %2147 = vst.msk [vmem:[#allocation28] sm:$0xff] %vm1104_vm11, %v2139_v7 }
 0xc4b   :  { %v2141_v37 = vpop.permute.xlu1 %2140  ;;  %v2143_v38 = vpop.permute.xlu0 %2142 }
 0xc4c   :  { %2148 = vst.msk [vmem:[#allocation28 + $0x8] sm:$0xff] %vm1104_vm11, %v2141_v37  ;;  %2149 = vst.msk [vmem:[#allocation28 + $0x10] sm:$0xff] %vm1104_vm11, %v2143_v38 }
 0xc4d   :  { %3059 = shalt.err (!%p3056_p6)
}
 0xc4e   :  { %s3947_s7 = sld [smem:[#allocation49_spill]] }
 0xc54   :  { %s3060_s15 = scalar_lea.hbm %s3947_s7, 384 }
 0xc55   :  { %p3061_p7 = scmp.ne.s32.totalorder %s3947_s7, %s3060_s15  ;;  %p3064_p8 = scmp.lt.u32.totalorder %s3060_s15, %s3947_s7 }
 0xc57   :  { %p3066_p9 = pnand %p3064_p8, %p3061_p7 }
 0xc59   :  { %3069 = shalt.err (!%p3066_p9)
}
 0xc5a   :  { %2173 = dma.vmem_to_hbm [thread:$0]  %s2168_s5, 384, %s3947_s7, [#allocation29], %s3091_s25, %s3091_s25, %s3092_s26  }
 0xc5b   :  { %3086 = dma.done.wait [#allocation5], 256  }
 0xc5c   :  { %3087 = vsyncadd [#allocation5], 4294967040 }
 0xc5d   :  { %3088 = dma.done.wait [#allocation29], 384  }
 0xc5e   :  { %3089 = vsyncadd [#allocation29], 4294966912 }
 0xc5f   :  { %2180 = vsyncpa [#allocation4], 1 }
 0xc60   :  { %2181 = vsyncpa [#allocation7], 1 }
 0xc61   :  { %2182 = vsyncpa [#allocation10], 1 }
 0xc62   :  { %2183 = vsyncpa [#allocation13], 1 }
 0xc63   :  { %2184 = vsyncpa [#allocation16], 1 }
 0xc64   :  { %2185 = vsyncpa [#allocation19], 1 }
 0xc65   :  { %2186 = vsyncpa [#allocation22], 1 }
 0xc66   :  { %2187 = vsyncpa [#allocation25], 1 }
 0xc67   :  { %2188 = vsyncpa [#allocation5], 1 }
 0xc68   :  { %2189 = vsyncpa [#allocation29], 1 }

</bundles_post_ra>
